<compile_context>
chip_gen: v7x
topology: tpu7x:2x2x1
jax: 0.10.0
libtpu: 0.0.40
codegen_flags: <defaults>
</compile_context>

<pallas_src>
import jax
import jax.numpy as jnp
from jax import lax
from jax.experimental import pallas as pl
from jax.experimental.pallas import tpu as pltpu


def cam_kernel(f1_ref, f2_ref, w_ref, out_a_ref, out_v_ref):
    bb, d, _ = f1_ref.shape

    f1 = f1_ref[...]                      # (BB, D, D) f32
    f2 = f2_ref[...]                      # (BB, D, D) f32
    f1_b = f1.astype(jnp.bfloat16)
    f2_b = f2.astype(jnp.bfloat16)
    w_b = w_ref[...].astype(jnp.bfloat16)

    # a1 = f1 @ W ; batches stacked along M so the 256-wide MXUs (v6e/v7x)
    # see M = BB*D rows in one pass.
    a1 = lax.dot_general(
        f1_b.reshape(bb * d, d), w_b,
        dimension_numbers=(((1,), (0,)), ((), ())),
        preferred_element_type=jnp.float32,
    ).reshape(bb, d, d)

    # cc[b,i,j] = sum_k a1[b,i,k] * f2[b,j,k]  (f2^T folded into the contraction)
    cc = lax.dot_general(
        a1.astype(jnp.bfloat16), f2_b,
        dimension_numbers=(((2,), (2,)), ((0,), (0,))),
        preferred_element_type=jnp.float32,
    )                                     # (BB, D, D) f32

    # audio_att = softmax(cc, dim=1): per batch, normalize over rows (axis 1).
    m0 = jnp.max(cc, axis=1, keepdims=True)
    e0 = jnp.exp(cc - m0)
    audio_att = e0 * pl.reciprocal(jnp.sum(e0, axis=1, keepdims=True), approx=True)

    # visual_att = softmax(cc^T, dim=1) == softmax(cc, dim=2)^T.  Keep the
    # untransposed probabilities p; the transpose is folded into the final dot.
    m1 = jnp.max(cc, axis=2, keepdims=True)
    e1 = jnp.exp(cc - m1)
    p = e1 * pl.reciprocal(jnp.sum(e1, axis=2, keepdims=True), approx=True)

    # out_a[b,c,i] = sum_r audio_att[b,r,c] * f1[b,i,r]  ==  (f1 @ audio_att)^T
    out_a_ref[...] = lax.dot_general(
        audio_att.astype(jnp.bfloat16), f1_b,
        dimension_numbers=(((1,), (2,)), ((0,), (0,))),
        preferred_element_type=jnp.float32,
    )

    # out_v[b,i,m] = sum_j p[b,i,j] * f2[b,m,j]  ==  (f2 @ p^T)^T
    out_v_ref[...] = lax.dot_general(
        p.astype(jnp.bfloat16), f2_b,
        dimension_numbers=(((2,), (2,)), ((0,), (0,))),
        preferred_element_type=jnp.float32,
    )


def cam_forward(f1_norm, f2_norm, corr_weights, block_b=None):
    B, D, D2 = f1_norm.shape
    assert D == D2 == corr_weights.shape[0] == corr_weights.shape[1]
    assert f2_norm.shape == (B, D, D)

    if block_b is None:
        # Two batches per grid step when they fit: doubles MXU utilization on
        # the 2x256x256 MXUs and amortizes the ~0.35us per-step overhead.
        block_b = 2 if (B % 2 == 0 and D <= 512) else 1
    assert B % block_b == 0

    out_shape = (
        jax.ShapeDtypeStruct((B, D, D), jnp.float32),
        jax.ShapeDtypeStruct((B, D, D), jnp.float32),
    )
    grid_spec = pltpu.PrefetchScalarGridSpec(
        num_scalar_prefetch=0,
        grid=(B // block_b,),
        in_specs=[
            pl.BlockSpec((block_b, D, D), lambda b: (b, 0, 0)),  # f1_norm slab
            pl.BlockSpec((block_b, D, D), lambda b: (b, 0, 0)),  # f2_norm slab
            pl.BlockSpec((D, D), lambda b: (0, 0)),              # shared weights
        ],
        out_specs=[
            pl.BlockSpec((block_b, D, D), lambda b: (b, 0, 0)),
            pl.BlockSpec((block_b, D, D), lambda b: (b, 0, 0)),
        ],
    )
    return pl.pallas_call(
        cam_kernel,
        out_shape=out_shape,
        grid_spec=grid_spec,
        compiler_params=pltpu.CompilerParams(
            dimension_semantics=("parallel",),
            vmem_limit_bytes=32 * 1024 * 1024,
        ),
    )(f1_norm, f2_norm, corr_weights)


def cam_reference(f1, f2, w, matmul_dtype=jnp.float32):
    # Pure-JAX mirror of the PyTorch forward, for validation only.  With
    # matmul_dtype=bfloat16 it applies the same operand rounding as the kernel
    # (f32 accumulation), so the comparison stays tight.
    f1m = f1.astype(matmul_dtype)
    f2m = f2.astype(matmul_dtype)
    wm = w.astype(matmul_dtype)
    a1 = jnp.einsum("bij,jk->bik", f1m, wm, preferred_element_type=jnp.float32)
    cc = jnp.einsum("bik,bjk->bij", a1.astype(matmul_dtype), f2m,
                    preferred_element_type=jnp.float32)
    audio_att = jax.nn.softmax(cc, axis=1)
    visual_att = jax.nn.softmax(jnp.swapaxes(cc, 1, 2), axis=1)
    att_a = jnp.einsum("bij,bjk->bik", f1m, audio_att.astype(matmul_dtype),
                       preferred_element_type=jnp.float32)
    att_v = jnp.einsum("bij,bjk->bik", f2m, visual_att.astype(matmul_dtype),
                       preferred_element_type=jnp.float32)
    return jnp.swapaxes(att_a, 1, 2), jnp.swapaxes(att_v, 1, 2)


if __name__ == "__main__":
    B, D = 2, 128   # small synthetic stand-in for the original 1024x1024 CAM

    key = jax.random.PRNGKey(0)
    k_w, k_f1, k_f2 = jax.random.split(key, 3)

    # Deterministic xavier_normal_-style init: std = sqrt(2 / (fan_in + fan_out))
    std = (2.0 / (D + D)) ** 0.5
    corr_weights = std * jax.random.normal(k_w, (D, D), dtype=jnp.float32)

    f1_norm = jax.random.normal(k_f1, (B, D, D), dtype=jnp.float32)
    f2_norm = jax.random.normal(k_f2, (B, D, D), dtype=jnp.float32)

    out_a, out_v = cam_forward(f1_norm, f2_norm, corr_weights)
    jax.block_until_ready((out_a, out_v))

    # Compare against a reference with matched bf16 operand rounding (the
    # kernel's matmuls run bf16 operands with f32 accumulation).
    ref_a, ref_v = cam_reference(f1_norm, f2_norm, corr_weights,
                                 matmul_dtype=jnp.bfloat16)
    assert out_a.shape == (B, D, D) and out_v.shape == (B, D, D)
    assert jnp.allclose(out_a, ref_a, atol=1e-2, rtol=1e-2)
    assert jnp.allclose(out_v, ref_v, atol=1e-2, rtol=1e-2)

    print("KERNEL_OK")
</pallas_src>

<mosaic_0001>
module attributes {stable_mosaic.version = 11 : i64} {
  func.func @cam_kernel(%arg0: i32, %arg1: memref<2x128x128xf32, #tpu.memory_space<vmem>>, %arg2: memref<2x128x128xf32, #tpu.memory_space<vmem>>, %arg3: memref<128x128xf32, #tpu.memory_space<vmem>>, %arg4: memref<2x128x128xf32, #tpu.memory_space<vmem>>, %arg5: memref<2x128x128xf32, #tpu.memory_space<vmem>>) attributes {dimension_semantics = [#tpu.dimension_semantics<parallel>], iteration_bounds = array<i64: 1>, scalar_prefetch = 0 : i64, scratch_operands = 0 : i64, tpu.core_type = #tpu.core_type<tc>, window_params = [{transform_indices = @transform_0, window_bounds = array<i64: 2, 128, 128>}, {transform_indices = @transform_1, window_bounds = array<i64: 2, 128, 128>}, {pipeline_mode = #tpu.pipeline_mode<synchronous>, transform_indices = @transform_2, window_bounds = array<i64: 128, 128>}, {transform_indices = @transform_3, window_bounds = array<i64: 2, 128, 128>}, {transform_indices = @transform_4, window_bounds = array<i64: 2, 128, 128>}]} {
    %c0 = arith.constant 0 : index
    %c0_0 = arith.constant 0 : index
    %c0_1 = arith.constant 0 : index
    %0 = vector.load %arg1[%c0, %c0_0, %c0_1] : memref<2x128x128xf32, #tpu.memory_space<vmem>>, vector<2x128x128xf32>
    %c0_2 = arith.constant 0 : index
    %c0_3 = arith.constant 0 : index
    %c0_4 = arith.constant 0 : index
    %1 = vector.load %arg2[%c0_2, %c0_3, %c0_4] : memref<2x128x128xf32, #tpu.memory_space<vmem>>, vector<2x128x128xf32>
    %2 = arith.truncf %0 : vector<2x128x128xf32> to vector<2x128x128xbf16>
    %3 = arith.truncf %1 : vector<2x128x128xf32> to vector<2x128x128xbf16>
    %c0_5 = arith.constant 0 : index
    %c0_6 = arith.constant 0 : index
    %4 = vector.load %arg3[%c0_5, %c0_6] : memref<128x128xf32, #tpu.memory_space<vmem>>, vector<128x128xf32>
    %5 = arith.truncf %4 : vector<128x128xf32> to vector<128x128xbf16>
    %6 = vector.shape_cast %2 : vector<2x128x128xbf16> to vector<256x128xbf16>
    %cst = arith.constant dense<0.000000e+00> : vector<256x128xf32>
    %7 = tpu.matmul %6, %5, %cst {dimension_numbers = #tpu.dot_dimension_numbers<[1], [0], [0], [1], [0, 0, 1, 1], [], []>} : vector<256x128xbf16>, vector<128x128xbf16>, vector<256x128xf32> -> vector<256x128xf32>
    %8 = vector.shape_cast %7 : vector<256x128xf32> to vector<2x128x128xf32>
    %9 = arith.truncf %8 : vector<2x128x128xf32> to vector<2x128x128xbf16>
    %cst_7 = arith.constant dense<0.000000e+00> : vector<2x128x128xf32>
    %10 = tpu.matmul %9, %3, %cst_7 {dimension_numbers = #tpu.dot_dimension_numbers<[2], [2], [1], [1], [0, 0, 0, 1, 1, 1], [0], [0]>} : vector<2x128x128xbf16>, vector<2x128x128xbf16>, vector<2x128x128xf32> -> vector<2x128x128xf32>
    %cst_8 = arith.constant dense<0xFF800000> : vector<2x128xf32>
    %11 = vector.multi_reduction <maximumf>, %10, %cst_8 [1] : vector<2x128x128xf32> to vector<2x128xf32>
    %12 = vector.shape_cast %11 : vector<2x128xf32> to vector<2x1x128xf32>
    %13 = vector.broadcast %12 : vector<2x1x128xf32> to vector<2x128x128xf32>
    %14 = arith.subf %10, %13 : vector<2x128x128xf32>
    %15 = math.exp %14 : vector<2x128x128xf32>
    %cst_9 = arith.constant dense<0.000000e+00> : vector<2x128xf32>
    %16 = vector.multi_reduction <add>, %15, %cst_9 [1] : vector<2x128x128xf32> to vector<2x128xf32>
    %17 = vector.shape_cast %16 : vector<2x128xf32> to vector<2x1x128xf32>
    %18 = tpu.reciprocal %17 {approx = true} : vector<2x1x128xf32> -> vector<2x1x128xf32>
    %19 = vector.broadcast %18 : vector<2x1x128xf32> to vector<2x128x128xf32>
    %20 = arith.mulf %15, %19 : vector<2x128x128xf32>
    %cst_10 = arith.constant dense<0xFF800000> : vector<2x128xf32>
    %21 = vector.multi_reduction <maximumf>, %10, %cst_10 [2] : vector<2x128x128xf32> to vector<2x128xf32>
    %22 = vector.shape_cast %21 : vector<2x128xf32> to vector<2x128x1xf32>
    %23 = vector.broadcast %22 : vector<2x128x1xf32> to vector<2x128x128xf32>
    %24 = arith.subf %10, %23 : vector<2x128x128xf32>
    %25 = math.exp %24 : vector<2x128x128xf32>
    %cst_11 = arith.constant dense<0.000000e+00> : vector<2x128xf32>
    %26 = vector.multi_reduction <add>, %25, %cst_11 [2] : vector<2x128x128xf32> to vector<2x128xf32>
    %27 = vector.shape_cast %26 : vector<2x128xf32> to vector<2x128x1xf32>
    %28 = tpu.reciprocal %27 {approx = true} : vector<2x128x1xf32> -> vector<2x128x1xf32>
    %29 = vector.broadcast %28 : vector<2x128x1xf32> to vector<2x128x128xf32>
    %30 = arith.mulf %25, %29 : vector<2x128x128xf32>
    %31 = arith.truncf %20 : vector<2x128x128xf32> to vector<2x128x128xbf16>
    %cst_12 = arith.constant dense<0.000000e+00> : vector<2x128x128xf32>
    %32 = tpu.matmul %31, %2, %cst_12 {dimension_numbers = #tpu.dot_dimension_numbers<[1], [2], [2], [1], [0, 0, 0, 2, 1, 1], [0], [0]>} : vector<2x128x128xbf16>, vector<2x128x128xbf16>, vector<2x128x128xf32> -> vector<2x128x128xf32>
    %c0_13 = arith.constant 0 : index
    %c0_14 = arith.constant 0 : index
    %c0_15 = arith.constant 0 : index
    %33 = vector.load %arg4[%c0_13, %c0_14, %c0_15] : memref<2x128x128xf32, #tpu.memory_space<vmem>>, vector<2x128x128xf32>
    tpu.vector_store %arg4[%c0_13, %c0_14, %c0_15], %32 {strides = array<i32>} : memref<2x128x128xf32, #tpu.memory_space<vmem>>, vector<2x128x128xf32>,
    %34 = arith.truncf %30 : vector<2x128x128xf32> to vector<2x128x128xbf16>
    %cst_16 = arith.constant dense<0.000000e+00> : vector<2x128x128xf32>
    %35 = tpu.matmul %34, %3, %cst_16 {dimension_numbers = #tpu.dot_dimension_numbers<[2], [2], [1], [1], [0, 0, 0, 1, 1, 1], [0], [0]>} : vector<2x128x128xbf16>, vector<2x128x128xbf16>, vector<2x128x128xf32> -> vector<2x128x128xf32>
    %c0_17 = arith.constant 0 : index
    %c0_18 = arith.constant 0 : index
    %c0_19 = arith.constant 0 : index
    %36 = vector.load %arg5[%c0_17, %c0_18, %c0_19] : memref<2x128x128xf32, #tpu.memory_space<vmem>>, vector<2x128x128xf32>
    tpu.vector_store %arg5[%c0_17, %c0_18, %c0_19], %35 {strides = array<i32>} : memref<2x128x128xf32, #tpu.memory_space<vmem>>, vector<2x128x128xf32>,
    return
  }
  func.func @transform_0(%arg0: i32) -> (i32, i32, i32) {
    %c0_i32 = arith.constant 0 : i32
    %c0_i32_0 = arith.constant 0 : i32
    %c0_i32_1 = arith.constant 0 : i32
    return %arg0, %c0_i32, %c0_i32_0 : i32, i32, i32
  }
  func.func @transform_1(%arg0: i32) -> (i32, i32, i32) {
    %c0_i32 = arith.constant 0 : i32
    %c0_i32_0 = arith.constant 0 : i32
    %c0_i32_1 = arith.constant 0 : i32
    return %arg0, %c0_i32, %c0_i32_0 : i32, i32, i32
  }
  func.func @transform_2(%arg0: i32) -> (i32, i32) {
    %c0_i32 = arith.constant 0 : i32
    %c0_i32_0 = arith.constant 0 : i32
    %c0_i32_1 = arith.constant 0 : i32
    return %c0_i32, %c0_i32_0 : i32, i32
  }
  func.func @transform_3(%arg0: i32) -> (i32, i32, i32) {
    %c0_i32 = arith.constant 0 : i32
    %c0_i32_0 = arith.constant 0 : i32
    %c0_i32_1 = arith.constant 0 : i32
    return %arg0, %c0_i32, %c0_i32_0 : i32, i32, i32
  }
  func.func @transform_4(%arg0: i32) -> (i32, i32, i32) {
    %c0_i32 = arith.constant 0 : i32
    %c0_i32_0 = arith.constant 0 : i32
    %c0_i32_1 = arith.constant 0 : i32
    return %arg0, %c0_i32, %c0_i32_0 : i32, i32, i32
  }
}

</mosaic_0001>

<bundles_post_ra>
// kernel: tpu_custom_call.1
= control target key start
LH: loop header
LB: loop body
LE: loop exit
PB: predicated region body
PF: predicated region fallthrough
CT: control target
= control target key end

     0   :  { %10 = vsyncpa [#allocation3], 0  ;;  %s3160_s0 = inlined_call_operand.hbm [shape: f32[2,128,128], index: 0, kind: input, shape index: {}]   ;;  %s3161_s1 = inlined_call_operand.hbm [shape: f32[2,128,128], index: 1, kind: input, shape index: {}]   ;;  %s3162_s2 = inlined_call_operand.hbm [shape: f32[128,128], index: 2, kind: input, shape index: {}]   ;;  %s3163_s3 = inlined_call_operand.hbm [shape: f32[2,128,128], index: 3, kind: output, shape index: {0}]   ;;  %s3164_s4 = inlined_call_operand.hbm [shape: f32[2,128,128], index: 4, kind: output, shape index: {1}]  }
   0x1   :  { %11 = vsyncpa [#allocation6], 0 }
   0x2   :  { %12 = vsyncpa [#allocation4], 0 }
   0x3   :  { %13 = vsyncpa [#allocation10], 0  ;;  %s2284_s15 = smov [#allocation5]   ;;  %s2285_s17 = smov [#allocation2]  }
   0x4   :  { %s31_s16 = sshll.u32 %s2284_s15, 4  ;;  %s19_s18 = sshll.u32 %s2285_s17, 4  ;;  %s32_s16 = int_to_ptr.vmem [resolvable:$true] %s31_s16  ;;  %s2316_s18 = int_to_ptr.vmem [resolvable:$true] %s19_s18 }
   0x5   :  { %s2166_s21 = scalar_lea.hbm %s3161_s1, 4096 }
   0x6   :  { %p2167_p0 = scmp.ne.s32.totalorder %s3161_s1, %s2166_s21  ;;  %p2170_p1 = scmp.lt.u32.totalorder %s2166_s21, %s3161_s1 }
   0x8   :  { %p2172_p2 = pnand %p2170_p1, %p2167_p0 }
   0xa   :  { %2175 = shalt.err (!%p2172_p2)
}
   0xb   :  { %s2176_s26 = scalar_lea.vmem %s32_s16, 4096  ;;  %p2181_p4 = scmp.lt.s32.totalorder %s32_s16, %s32_s16 }
   0xc   :  { %p2177_p3 = scmp.ne.s32.totalorder %s32_s16, %s2176_s26  ;;  %p2182_p5 = scmp.lt.s32.totalorder %s2176_s26, %s2176_s26 }
   0xe   :  { %p2183_p6 = por %p2182_p5, %p2181_p4 }
  0x10   :  { %p2184_p7 = pnand %p2183_p6, %p2177_p3 }
  0x12   :  { %2187 = shalt.err (!%p2184_p7)
}
  0x13   :  { %s2286_s27 = smov 128   ;;  %s2287_s28 = smov 8  }
  0x14   :  { %37 = dma.hbm_to_vmem [thread:$0]  %s3161_s1, 4096, %s32_s16, [#allocation6], %s2286_s27, %s2286_s27, %s2287_s28  }
  0x15   :  { %s2188_s7 = scalar_lea.hbm %s3160_s0, 4096 }
  0x16   :  { %p2189_p8 = scmp.ne.s32.totalorder %s3160_s0, %s2188_s7  ;;  %p2192_p9 = scmp.lt.u32.totalorder %s2188_s7, %s3160_s0 }
  0x18   :  { %p2194_p10 = pnand %p2192_p9, %p2189_p8 }
  0x1a   :  { %2197 = shalt.err (!%p2194_p10)
}
  0x1b   :  { %s2198_s12 = scalar_lea.vmem %s2316_s18, 4096  ;;  %p2203_p12 = scmp.lt.s32.totalorder %s2316_s18, %s2316_s18 }
  0x1c   :  { %p2199_p11 = scmp.ne.s32.totalorder %s2316_s18, %s2198_s12  ;;  %p2204_p13 = scmp.lt.s32.totalorder %s2198_s12, %s2198_s12 }
  0x1e   :  { %p2205_p0 = por %p2204_p13, %p2203_p12 }
  0x20   :  { %p2206_p1 = pnand %p2205_p0, %p2199_p11 }
  0x22   :  { %2209 = shalt.err (!%p2206_p1)
}
  0x23   :  { %25 = dma.hbm_to_vmem [thread:$0]  %s3160_s0, 4096, %s2316_s18, [#allocation3], %s2286_s27, %s2286_s27, %s2287_s28  }
  0x24   :  { %s2288_s14 = smov [#allocation7]   ;;  %s2210_s19 = scalar_lea.hbm %s3162_s2, 2048 }
  0x25   :  { %s43_s15 = sshll.u32 %s2288_s14, 4  ;;  %p2211_p2 = scmp.ne.s32.totalorder %s3162_s2, %s2210_s19  ;;  %s44_s15 = int_to_ptr.vmem [resolvable:$true] %s43_s15 }
  0x26   :  { %p2214_p3 = scmp.lt.u32.totalorder %s2210_s19, %s3162_s2 }
  0x28   :  { %p2216_p4 = pnand %p2214_p3, %p2211_p2 }
  0x2a   :  { %2219 = shalt.err (!%p2216_p4)
}
  0x2b   :  { %s2220_s24 = scalar_lea.vmem %s44_s15, 2048  ;;  %p2225_p6 = scmp.lt.s32.totalorder %s44_s15, %s44_s15 }
  0x2c   :  { %p2221_p5 = scmp.ne.s32.totalorder %s44_s15, %s2220_s24  ;;  %p2226_p7 = scmp.lt.s32.totalorder %s2220_s24, %s2220_s24 }
  0x2e   :  { %p2227_p8 = por %p2226_p7, %p2225_p6 }
  0x30   :  { %p2228_p9 = pnand %p2227_p8, %p2221_p5 }
  0x32   :  { %2231 = shalt.err (!%p2228_p9)
}
  0x33   :  { %49 = dma.hbm_to_vmem [thread:$0]  %s3162_s2, 2048, %s44_s15, [#allocation6], %s2286_s27, %s2286_s27, %s2287_s28  }
  0x34   :  { %2276 = dma.done.wait [#allocation3], 4096  }
  0x35   :  { %2277 = vsyncadd [#allocation3], 4294963200 }
  0x36   :  { %2278 = dma.done.wait [#allocation6], 6144  }
  0x37   :  { %2279 = vsyncadd [#allocation6], 4294961152  ;;  %v156_v0 = vld [vmem:[#allocation7] sm:$0xff]  ;;  %v157_v1 = vld [vmem:[#allocation7 + $0x8] sm:$0xff]  ;;  %s2289_s2 = smov [#allocation8]  }
  0x38   :  { %v158_v2 = vld [vmem:[#allocation7 + $0x10] sm:$0xff]  ;;  %v172_v3 = vpack.c.bf16 %v157_v1, %v156_v0  ;;  %v159_v4 = vld [vmem:[#allocation7 + $0x18] sm:$0xff]  ;;  %v160_v6 = vld [vmem:[#allocation7 + $0x20] sm:$0xff]  ;;  %s1574_s25 = sshll.u32 %s2289_s2, 4  ;;  %s1575_s25 = int_to_ptr.vmem [resolvable:$true] %s1574_s25 }
  0x39   :  { %v173_v5 = vpack.c.bf16 %v159_v4, %v158_v2  ;;  %v161_v7 = vld [vmem:[#allocation7 + $0x28] sm:$0xff]  ;;  %v60_v9 = vld [vmem:[#allocation2] sm:$0xff]  ;;  %v162_v11 = vld [vmem:[#allocation7 + $0x30] sm:$0xff]  ;;  %s2232_s26 = scalar_lea.vmem %s1575_s25, 4096  ;;  %p2237_p11 = scmp.lt.s32.totalorder %s1575_s25, %s1575_s25 }
  0x3a   :  { %1723 = vmatprep.subr.bf16.mxu0 %v172_v3  ;;  %v174_v8 = vpack.c.bf16 %v161_v7, %v160_v6  ;;  %v61_v10 = vld [vmem:[#allocation2 + $0x8] sm:$0xff]  ;;  %v163_v12 = vld [vmem:[#allocation7 + $0x38] sm:$0xff]  ;;  %v164_v15 = vld [vmem:[#allocation7 + $0x40] sm:$0xff]  ;;  %p2233_p10 = scmp.ne.s32.totalorder %s1575_s25, %s2232_s26  ;;  %p2238_p12 = scmp.lt.s32.totalorder %s2232_s26, %s2232_s26 }
  0x3b   :  { %1724 = vmatpush3.bf16.msra.mxu0 %v172_v3  ;;  %v2368_v13 = vpack.c.bf16 %v61_v10, %v60_v9  ;;  %v175_v14 = vpack.c.bf16 %v163_v12, %v162_v11  ;;  %v165_v16 = vld [vmem:[#allocation7 + $0x48] sm:$0xff]  ;;  %v166_v18 = vld [vmem:[#allocation7 + $0x50] sm:$0xff]  ;;  %v167_v19 = vld [vmem:[#allocation7 + $0x58] sm:$0xff] }
  0x3c   :  { %1725 = vmatprep.subr.bf16.mxu0 %v173_v5  ;;  %v176_v17 = vpack.c.bf16 %v165_v16, %v164_v15  ;;  %v92_v20 = vld [vmem:[#allocation5] sm:$0xff]  ;;  %v93_v21 = vld [vmem:[#allocation5 + $0x8] sm:$0xff]  ;;  %v94_v22 = vld [vmem:[#allocation5 + $0x10] sm:$0xff]  ;;  %v177_v23 = vpack.c.bf16 %v167_v19, %v166_v18  ;;  %p2239_p13 = por %p2238_p12, %p2237_p11 }
  0x3d   :  { %1739 = vmatprep.mubr.bf16.mxu0 %v2368_v13  ;;  %v2371_v24 = vpack.c.bf16 %v93_v21, %v92_v20  ;;  %v95_v25 = vld [vmem:[#allocation5 + $0x18] sm:$0xff]  ;;  %v168_v26 = vld [vmem:[#allocation7 + $0x60] sm:$0xff]  ;;  %v169_v27 = vld [vmem:[#allocation7 + $0x68] sm:$0xff] }
  0x3e   :  { %v2373_v28 = vpack.c.bf16 %v95_v25, %v94_v22  ;;  %v178_v29 = vpack.c.bf16 %v169_v27, %v168_v26  ;;  %v170_v30 = vld [vmem:[#allocation7 + $0x70] sm:$0xff]  ;;  %v171_v31 = vld [vmem:[#allocation7 + $0x78] sm:$0xff]  ;;  %v96_v32 = vld [vmem:[#allocation5 + $0x20] sm:$0xff]  ;;  %p2240_p0 = pnand %p2239_p13, %p2233_p10 }
  0x3f   :  { %1726 = vmatpush3.bf16.msra.mxu0 %v173_v5  ;;  %3206 = vst [vmem:[#allocation15_spill] sm:$0xff] %v2371_v24  ;;  %1771 = vmatprep.subr.bf16.mxu1 %v2371_v24  ;;  %v97_v33 = vld [vmem:[#allocation5 + $0x28] sm:$0xff]  ;;  %v179_v34 = vpack.c.bf16 %v171_v31, %v170_v30  ;;  %v108_v36 = vld [vmem:[#allocation5 + $0x80] sm:$0xff]  ;;  %v62_v38 = vld [vmem:[#allocation2 + $0x10] sm:$0xff] }
  0x40   :  { %1727 = vmatprep.subr.bf16.mxu0 %v174_v8  ;;  %3207 = vst [vmem:[#allocation16_spill] sm:$0xff] %v2373_v28  ;;  %1772 = vmatpush3.bf16.xpose.msra.mxu1 %v2371_v24  ;;  %v2378_v35 = vpack.c.bf16 %v97_v33, %v96_v32  ;;  %v109_v37 = vld [vmem:[#allocation5 + $0x88] sm:$0xff]  ;;  %v63_v39 = vld [vmem:[#allocation2 + $0x18] sm:$0xff]  ;;  %v64_v40 = vld [vmem:[#allocation2 + $0x20] sm:$0xff] }
  0x41   :  { %1773 = vmatprep.subr.bf16.mxu1 %v2373_v28  ;;  %v65_v41 = vld [vmem:[#allocation2 + $0x28] sm:$0xff]  ;;  %v2382_v42 = vpack.c.bf16 %v109_v37, %v108_v36  ;;  %v98_v43 = vld [vmem:[#allocation5 + $0x30] sm:$0xff]  ;;  %v99_v44 = vld [vmem:[#allocation5 + $0x38] sm:$0xff]  ;;  %v2384_v45 = vpack.c.bf16 %v63_v39, %v62_v38 }
  0x42   :  { %3208 = vst [vmem:[#allocation17_spill] sm:$0xff] %v2378_v35  ;;  %v2386_v46 = vpack.c.bf16 %v65_v41, %v64_v40  ;;  %v2388_v47 = vpack.c.bf16 %v99_v44, %v98_v43  ;;  %v110_v48 = vld [vmem:[#allocation5 + $0x90] sm:$0xff]  ;;  %v111_v49 = vld [vmem:[#allocation5 + $0x98] sm:$0xff]  ;;  %v68_v52 = vld [vmem:[#allocation2 + $0x40] sm:$0xff] }
  0x43   :  { %1728 = vmatpush3.bf16.msra.mxu0 %v174_v8  ;;  %3209 = vst [vmem:[#allocation18_spill] sm:$0xff] %v2382_v42  ;;  %v66_v50 = vld [vmem:[#allocation2 + $0x30] sm:$0xff]  ;;  %v67_v51 = vld [vmem:[#allocation2 + $0x38] sm:$0xff]  ;;  %v69_v53 = vld [vmem:[#allocation2 + $0x48] sm:$0xff]  ;;  %v2395_v56 = vpack.c.bf16 %v111_v49, %v110_v48 }
  0x44   :  { %1729 = vmatprep.subr.bf16.mxu0 %v175_v14  ;;  %3210 = vst [vmem:[#allocation19_spill] sm:$0xff] %v2388_v47  ;;  %v100_v54 = vld [vmem:[#allocation5 + $0x40] sm:$0xff]  ;;  %v101_v55 = vld [vmem:[#allocation5 + $0x48] sm:$0xff]  ;;  %v2397_v57 = vpack.c.bf16 %v67_v51, %v66_v50  ;;  %v2399_v58 = vpack.c.bf16 %v69_v53, %v68_v52  ;;  %v70_v62 = vld [vmem:[#allocation2 + $0x50] sm:$0xff] }
  0x45   :  { %3211 = vst [vmem:[#allocation20_spill] sm:$0xff] %v2395_v56  ;;  %v2401_v59 = vpack.c.bf16 %v101_v55, %v100_v54  ;;  %v112_v60 = vld [vmem:[#allocation5 + $0xa0] sm:$0xff]  ;;  %v113_v61 = vld [vmem:[#allocation5 + $0xa8] sm:$0xff]  ;;  %v71_v63 = vld [vmem:[#allocation2 + $0x58] sm:$0xff] }
  0x46   :  { %v72_v0 = vld [vmem:[#allocation2 + $0x60] sm:$0xff]  ;;  %v73_v1 = vld [vmem:[#allocation2 + $0x68] sm:$0xff]  ;;  %v102_v2 = vld [vmem:[#allocation5 + $0x50] sm:$0xff]  ;;  %v2409_v4 = vpack.c.bf16 %v113_v61, %v112_v60  ;;  %v2411_v5 = vpack.c.bf16 %v71_v63, %v70_v62 }
  0x47   :  { %1730 = vmatpush3.bf16.msra.mxu0 %v175_v14  ;;  %3212 = vst [vmem:[#allocation21_spill] sm:$0xff] %v2401_v59  ;;  %v103_v3 = vld [vmem:[#allocation5 + $0x58] sm:$0xff]  ;;  %v2413_v6 = vpack.c.bf16 %v73_v1, %v72_v0  ;;  %v114_v8 = vld [vmem:[#allocation5 + $0xb0] sm:$0xff]  ;;  %v76_v12 = vld [vmem:[#allocation2 + $0x80] sm:$0xff] }
  0x48   :  { %1731 = vmatprep.subr.bf16.mxu0 %v176_v17  ;;  %1774 = vmatpush3.bf16.xpose.msra.mxu1 %v2373_v28  ;;  %3213 = vst [vmem:[#allocation22_spill] sm:$0xff] %v2409_v4  ;;  %v2415_v7 = vpack.c.bf16 %v103_v3, %v102_v2  ;;  %v115_v9 = vld [vmem:[#allocation5 + $0xb8] sm:$0xff]  ;;  %v74_v10 = vld [vmem:[#allocation2 + $0x70] sm:$0xff]  ;;  %v77_v14 = vld [vmem:[#allocation2 + $0x88] sm:$0xff] }
  0x49   :  { %1775 = vmatprep.subr.bf16.mxu1 %v2378_v35  ;;  %v75_v11 = vld [vmem:[#allocation2 + $0x78] sm:$0xff]  ;;  %v104_v15 = vld [vmem:[#allocation5 + $0x60] sm:$0xff]  ;;  %v105_v16 = vld [vmem:[#allocation5 + $0x68] sm:$0xff]  ;;  %v2427_v19 = vpack.c.bf16 %v77_v14, %v76_v12 }
  0x4a   :  { %3214 = vst [vmem:[#allocation23_spill] sm:$0xff] %v2415_v7  ;;  %v2425_v18 = vpack.c.bf16 %v75_v11, %v74_v10  ;;  %v2429_v20 = vpack.c.bf16 %v105_v16, %v104_v15  ;;  %v78_v21 = vld [vmem:[#allocation2 + $0x90] sm:$0xff]  ;;  %v79_v22 = vld [vmem:[#allocation2 + $0x98] sm:$0xff]  ;;  %v81_v25 = vld [vmem:[#allocation2 + $0xa8] sm:$0xff] }
  0x4b   :  { %1732 = vmatpush3.bf16.msra.mxu0 %v176_v17  ;;  %v2423_v17 = vpack.c.bf16 %v115_v9, %v114_v8  ;;  %v106_v26 = vld [vmem:[#allocation5 + $0x70] sm:$0xff]  ;;  %v107_v27 = vld [vmem:[#allocation5 + $0x78] sm:$0xff]  ;;  %v85_v36 = vld [vmem:[#allocation2 + $0xc8] sm:$0xff] }
  0x4c   :  { %1733 = vmatprep.subr.bf16.mxu0 %v177_v23  ;;  %3216 = vst [vmem:[#allocation25_spill] sm:$0xff] %v2429_v20  ;;  %v2441_v31 = vpack.c.bf16 %v107_v27, %v106_v26  ;;  %v82_v32 = vld [vmem:[#allocation2 + $0xb0] sm:$0xff]  ;;  %v83_v33 = vld [vmem:[#allocation2 + $0xb8] sm:$0xff]  ;;  %v88_v41 = vld [vmem:[#allocation2 + $0xe0] sm:$0xff] }
  0x4d   :  { %3215 = vst [vmem:[#allocation24_spill] sm:$0xff] %v2423_v17  ;;  %v2448_v37 = vpack.c.bf16 %v83_v33, %v82_v32  ;;  %v86_v39 = vld [vmem:[#allocation2 + $0xd0] sm:$0xff]  ;;  %v87_v40 = vld [vmem:[#allocation2 + $0xd8] sm:$0xff]  ;;  %v89_v43 = vld [vmem:[#allocation2 + $0xe8] sm:$0xff] }
  0x4e   :  { %3217 = vst [vmem:[#allocation26_spill] sm:$0xff] %v2441_v31  ;;  %v2456_v44 = vpack.c.bf16 %v87_v40, %v86_v39  ;;  %v2458_v48 = vpack.c.bf16 %v89_v43, %v88_v41  ;;  %v90_v49 = vld [vmem:[#allocation2 + $0xf0] sm:$0xff]  ;;  %v91_v50 = vld [vmem:[#allocation2 + $0xf8] sm:$0xff]  ;;  %v116_v52 = vld [vmem:[#allocation5 + $0xc0] sm:$0xff] }
  0x4f   :  { %1734 = vmatpush3.bf16.msra.mxu0 %v177_v23  ;;  %v80_v23 = vld [vmem:[#allocation2 + $0xa0] sm:$0xff]  ;;  %v2462_v51 = vpack.c.bf16 %v91_v50, %v90_v49  ;;  %v117_v53 = vld [vmem:[#allocation5 + $0xc8] sm:$0xff]  ;;  %v118_v55 = vld [vmem:[#allocation5 + $0xd0] sm:$0xff] }
  0x50   :  { %1735 = vmatprep.subr.bf16.mxu0 %v178_v29  ;;  %1776 = vmatpush3.bf16.xpose.msra.mxu1 %v2378_v35  ;;  %v2439_v30 = vpack.c.bf16 %v81_v25, %v80_v23  ;;  %v2465_v54 = vpack.c.bf16 %v117_v53, %v116_v52  ;;  %v119_v60 = vld [vmem:[#allocation5 + $0xd8] sm:$0xff]  ;;  %v120_v62 = vld [vmem:[#allocation5 + $0xe0] sm:$0xff]  ;;  %v121_v63 = vld [vmem:[#allocation5 + $0xe8] sm:$0xff] }
  0x51   :  { %1777 = vmatprep.subr.bf16.mxu1 %v2388_v47  ;;  %v2469_v61 = vpack.c.bf16 %v119_v60, %v118_v55  ;;  %v2473_v0 = vpack.c.bf16 %v121_v63, %v120_v62  ;;  %v122_v1 = vld [vmem:[#allocation5 + $0xf0] sm:$0xff]  ;;  %v123_v2 = vld [vmem:[#allocation5 + $0xf8] sm:$0xff] }
  0x52   :  { %3218 = vst [vmem:[#allocation27_spill] sm:$0xff] %v2465_v54  ;;  %v2477_v3 = vpack.c.bf16 %v123_v2, %v122_v1 }
  0x53   :  { %1736 = vmatpush3.bf16.msra.mxu0 %v178_v29  ;;  %v2437_v29 = vpack.c.bf16 %v79_v22, %v78_v21  ;;  %3219 = vst [vmem:[#allocation28_spill] sm:$0xff] %v2469_v61  ;;  %3220 = vst [vmem:[#allocation29_spill] sm:$0xff] %v2473_v0 }
  0x54   :  { %1737 = vmatprep.subr.bf16.mxu0 %v179_v34  ;;  %3221 = vst [vmem:[#allocation30_spill] sm:$0xff] %v2477_v3 }
  0x57   :  { %1738 = vmatpush3.bf16.msra.mxu0 %v179_v34  ;;  %v84_v34 = vld [vmem:[#allocation2 + $0xc0] sm:$0xff] }
  0x58   :  { %1803 = vmatprep.subr.bf16.mxu0 %v2382_v42  ;;  %1778 = vmatpush3.bf16.xpose.msra.mxu1 %v2388_v47  ;;  %v2450_v38 = vpack.c.bf16 %v85_v36, %v84_v34 }
  0x59   :  { %1779 = vmatprep.subr.bf16.mxu1 %v2401_v59 }
  0x5a   :  { %1740 = vmatmul.mubr.bf16.vlgmr.msra.gmra.mrb[0].mxu0 %v2384_v45 }
  0x5b   :  { %1743 = vmatprep.mubr.bf16.mxu0 %v2386_v46 }
  0x60   :  { %1804 = vmatpush3.bf16.xpose.msra.mxu0 %v2382_v42  ;;  %1780 = vmatpush3.bf16.xpose.msra.mxu1 %v2401_v59 }
  0x61   :  { %1805 = vmatprep.subr.bf16.mxu0 %v2395_v56  ;;  %1781 = vmatprep.subr.bf16.mxu1 %v2415_v7 }
  0x62   :  { %1744 = vmatmul.mubr.bf16.gmra.mrb[4].mxu0 %v2397_v57 }
  0x63   :  { %1747 = vmatprep.mubr.bf16.mxu0 %v2399_v58 }
  0x68   :  { %1806 = vmatpush3.bf16.xpose.msra.mxu0 %v2395_v56  ;;  %1782 = vmatpush3.bf16.xpose.msra.mxu1 %v2415_v7 }
  0x69   :  { %1807 = vmatprep.subr.bf16.mxu0 %v2409_v4  ;;  %1783 = vmatprep.subr.bf16.mxu1 %v2429_v20 }
  0x6a   :  { %1748 = vmatmul.mubr.bf16.gmra.mrb[8].mxu0 %v2411_v5 }
  0x6b   :  { %1751 = vmatprep.mubr.bf16.mxu0 %v2413_v6 }
  0x70   :  { %1808 = vmatpush3.bf16.xpose.msra.mxu0 %v2409_v4  ;;  %1784 = vmatpush3.bf16.xpose.msra.mxu1 %v2429_v20 }
  0x71   :  { %1809 = vmatprep.subr.bf16.mxu0 %v2423_v17  ;;  %1785 = vmatprep.subr.bf16.mxu1 %v2441_v31 }
  0x72   :  { %1752 = vmatmul.mubr.bf16.gmra.mrb[12].mxu0 %v2425_v18 }
  0x73   :  { %1755 = vmatprep.mubr.bf16.mxu0 %v2427_v19 }
  0x78   :  { %1810 = vmatpush3.bf16.xpose.msra.mxu0 %v2423_v17  ;;  %1786 = vmatpush3.bf16.xpose.msra.mxu1 %v2441_v31 }
  0x79   :  { %1835 = vmatprep.subr.bf16.mxu1 %v2368_v13  ;;  %1811 = vmatprep.subr.bf16.mxu0 %v2465_v54 }
  0x7a   :  { %1756 = vmatmul.mubr.bf16.gmra.mrb[16].mxu0 %v2437_v29 }
  0x7b   :  { %1759 = vmatprep.mubr.bf16.mxu0 %v2439_v30 }
  0x80   :  { %1812 = vmatpush3.bf16.xpose.msra.mxu0 %v2465_v54 }
  0x81   :  { %1813 = vmatprep.subr.bf16.mxu0 %v2469_v61 }
  0x82   :  { %1760 = vmatmul.mubr.bf16.gmra.mrb[20].mxu0 %v2448_v37 }
  0x83   :  { %1763 = vmatprep.mubr.bf16.mxu0 %v2450_v38 }
  0x88   :  { %1814 = vmatpush3.bf16.xpose.msra.mxu0 %v2469_v61 }
  0x89   :  { %1815 = vmatprep.subr.bf16.mxu0 %v2473_v0 }
  0x8a   :  { %1764 = vmatmul.mubr.bf16.gmra.mrb[24].mxu0 %v2456_v44 }
  0x8b   :  { %1767 = vmatprep.mubr.bf16.mxu0 %v2458_v48 }
  0x90   :  { %1816 = vmatpush3.bf16.xpose.msra.mxu0 %v2473_v0 }
  0x91   :  { %1817 = vmatprep.subr.bf16.mxu0 %v2477_v3 }
  0x92   :  { %1768 = vmatmul.mubr.bf16.gmra.mrb[28].mxu0 %v2462_v51 }
  0x98   :  { %1818 = vmatpush3.bf16.xpose.msra.mxu0 %v2477_v3 }
  0x99   :  { %1867 = vmatprep.subr.bf16.mxu0 %v2427_v19 }
 0x12d   :  { %v1741_v8 = vpop.f32.mrb[0].mxu0 }
 0x12e   :  { %v214_v9 = vpop.f32.mrb[1].mxu0 }
 0x12f   :  { %v1742_v10 = vpop.f32.mrb[2].mxu0 }
 0x130   :  { %v342_v11 = vpack.c.bf16 %v1742_v10, %v1741_v8  ;;  %v217_v12 = vpop.f32.mrb[3].mxu0 }
 0x131   :  { %v341_v14 = vpack.c.bf16 %v217_v12, %v214_v9 }
 0x133   :  { %1787 = vmatprep.mubr.bf16.mxu1 %v341_v14 }
 0x134   :  { %1788 = vmatmul.mubr.bf16.vlgmr.msra.gmra.mrb[0].mxu1 %v342_v11 }
 0x135   :  { %v1745_v15 = vpop.f32.mrb[4].mxu0  ;;  %1836 = vmatpush3.bf16.xpose.msra.mxu1 %v2368_v13 }
 0x136   :  { %v230_v16 = vpop.f32.mrb[5].mxu0  ;;  %1837 = vmatprep.subr.bf16.mxu1 %v2384_v45 }
 0x137   :  { %v1746_v21 = vpop.f32.mrb[6].mxu0 }
 0x138   :  { %v344_v22 = vpack.c.bf16 %v1746_v21, %v1745_v15  ;;  %v233_v23 = vpop.f32.mrb[7].mxu0 }
 0x139   :  { %v343_v25 = vpack.c.bf16 %v233_v23, %v230_v16 }
 0x13b   :  { %1791 = vmatprep.mubr.bf16.mxu1 %v343_v25 }
 0x13c   :  { %1792 = vmatmul.mubr.bf16.gmra.mrb[4].mxu1 %v344_v22 }
 0x13d   :  { %v1749_v26 = vpop.f32.mrb[8].mxu0  ;;  %1838 = vmatpush3.bf16.xpose.msra.mxu1 %v2384_v45 }
 0x13e   :  { %v246_v27 = vpop.f32.mrb[9].mxu0  ;;  %1839 = vmatprep.subr.bf16.mxu1 %v2386_v46 }
 0x13f   :  { %v1750_v32 = vpop.f32.mrb[10].mxu0 }
 0x140   :  { %v346_v33 = vpack.c.bf16 %v1750_v32, %v1749_v26  ;;  %v249_v34 = vpop.f32.mrb[11].mxu0 }
 0x141   :  { %v345_v36 = vpack.c.bf16 %v249_v34, %v246_v27 }
 0x143   :  { %1795 = vmatprep.mubr.bf16.mxu1 %v345_v36 }
 0x144   :  { %1796 = vmatmul.mubr.bf16.gmra.mrb[8].mxu1 %v346_v33 }
 0x145   :  { %v1753_v13 = vpop.f32.mrb[12].mxu0  ;;  %1840 = vmatpush3.bf16.xpose.msra.mxu1 %v2386_v46 }
 0x146   :  { %v262_v39 = vpop.f32.mrb[13].mxu0  ;;  %1841 = vmatprep.subr.bf16.mxu1 %v2397_v57 }
 0x147   :  { %v1754_v40 = vpop.f32.mrb[14].mxu0 }
 0x148   :  { %v348_v41 = vpack.c.bf16 %v1754_v40, %v1753_v13  ;;  %v265_v43 = vpop.f32.mrb[15].mxu0 }
 0x149   :  { %v347_v49 = vpack.c.bf16 %v265_v43, %v262_v39 }
 0x14b   :  { %1799 = vmatprep.mubr.bf16.mxu1 %v347_v49 }
 0x14c   :  { %1800 = vmatmul.mubr.bf16.gmra.mrb[12].mxu1 %v348_v41 }
 0x14d   :  { %v1757_v45 = vpop.f32.mrb[16].mxu0  ;;  %1842 = vmatpush3.bf16.xpose.msra.mxu1 %v2397_v57 }
 0x14e   :  { %v278_v50 = vpop.f32.mrb[17].mxu0  ;;  %1843 = vmatprep.subr.bf16.mxu1 %v2399_v58 }
 0x14f   :  { %v1758_v52 = vpop.f32.mrb[18].mxu0 }
 0x150   :  { %v350_v53 = vpack.c.bf16 %v1758_v52, %v1757_v45  ;;  %v281_v55 = vpop.f32.mrb[19].mxu0 }
 0x151   :  { %v349_v60 = vpack.c.bf16 %v281_v55, %v278_v50 }
 0x153   :  { %1819 = vmatprep.mubr.bf16.mxu0 %v349_v60 }
 0x154   :  { %1820 = vmatmul.mubr.bf16.vlgmr.msra.gmra.mrb[32].mxu0 %v350_v53 }
 0x155   :  { %v1761_v46 = vpop.f32.mrb[20].mxu0  ;;  %1844 = vmatpush3.bf16.xpose.msra.mxu1 %v2399_v58  ;;  %1868 = vmatpush3.bf16.xpose.msra.mxu0 %v2427_v19 }
 0x156   :  { %v294_v62 = vpop.f32.mrb[21].mxu0  ;;  %1845 = vmatprep.subr.bf16.mxu1 %v2411_v5  ;;  %1869 = vmatprep.subr.bf16.mxu0 %v2437_v29 }
 0x157   :  { %v1762_v57 = vpop.f32.mrb[22].mxu0 }
 0x158   :  { %v352_v63 = vpack.c.bf16 %v1762_v57, %v1761_v46  ;;  %v297_v1 = vpop.f32.mrb[23].mxu0 }
 0x159   :  { %v351_v2 = vpack.c.bf16 %v297_v1, %v294_v62 }
 0x15b   :  { %1823 = vmatprep.mubr.bf16.mxu0 %v351_v2 }
 0x15c   :  { %1824 = vmatmul.mubr.bf16.gmra.mrb[36].mxu0 %v352_v63 }
 0x15d   :  { %v1765_v8 = vpop.f32.mrb[24].mxu0  ;;  %1846 = vmatpush3.bf16.xpose.msra.mxu1 %v2411_v5  ;;  %1870 = vmatpush3.bf16.xpose.msra.mxu0 %v2437_v29 }
 0x15e   :  { %v310_v9 = vpop.f32.mrb[25].mxu0  ;;  %1847 = vmatprep.subr.bf16.mxu1 %v2413_v6  ;;  %1871 = vmatprep.subr.bf16.mxu0 %v2439_v30 }
 0x15f   :  { %v1766_v58 = vpop.f32.mrb[26].mxu0 }
 0x160   :  { %v354_v19 = vpack.c.bf16 %v1766_v58, %v1765_v8  ;;  %v313_v10 = vpop.f32.mrb[27].mxu0 }
 0x161   :  { %v353_v11 = vpack.c.bf16 %v313_v10, %v310_v9 }
 0x163   :  { %1827 = vmatprep.mubr.bf16.mxu0 %v353_v11 }
 0x164   :  { %1828 = vmatmul.mubr.bf16.gmra.mrb[40].mxu0 %v354_v19 }
 0x165   :  { %v1769_v12 = vpop.f32.mrb[28].mxu0  ;;  %1848 = vmatpush3.bf16.xpose.msra.mxu1 %v2413_v6  ;;  %1872 = vmatpush3.bf16.xpose.msra.mxu0 %v2439_v30 }
 0x166   :  { %v326_v14 = vpop.f32.mrb[29].mxu0  ;;  %1849 = vmatprep.subr.bf16.mxu1 %v2425_v18  ;;  %1873 = vmatprep.subr.bf16.mxu0 %v2448_v37 }
 0x167   :  { %v1770_v5 = vpop.f32.mrb[30].mxu0 }
 0x168   :  { %v356_v29 = vpack.c.bf16 %v1770_v5, %v1769_v12  ;;  %v329_v15 = vpop.f32.mrb[31].mxu0 }
 0x169   :  { %v355_v16 = vpack.c.bf16 %v329_v15, %v326_v14 }
 0x16b   :  { %1831 = vmatprep.mubr.bf16.mxu0 %v355_v16 }
 0x16c   :  { %1832 = vmatmul.mubr.bf16.gmra.mrb[44].mxu0 %v356_v29 }
 0x16d   :  { %1850 = vmatpush3.bf16.xpose.msra.mxu1 %v2425_v18  ;;  %1874 = vmatpush3.bf16.xpose.msra.mxu0 %v2448_v37 }
 0x16e   :  { %1899 = vmatprep.subr.bf16.mxu1 %v2371_v24  ;;  %1875 = vmatprep.subr.bf16.mxu0 %v2450_v38 }
 0x175   :  { %1876 = vmatpush3.bf16.xpose.msra.mxu0 %v2450_v38 }
 0x176   :  { %1877 = vmatprep.subr.bf16.mxu0 %v2456_v44 }
 0x17d   :  { %1878 = vmatpush3.bf16.xpose.msra.mxu0 %v2456_v44 }
 0x17e   :  { %1879 = vmatprep.subr.bf16.mxu0 %v2458_v48 }
 0x185   :  { %1880 = vmatpush3.bf16.xpose.msra.mxu0 %v2458_v48 }
 0x186   :  { %1881 = vmatprep.subr.bf16.mxu0 %v2462_v51 }
 0x18d   :  { %1882 = vmatpush3.bf16.xpose.msra.mxu0 %v2462_v51 }
 0x18e   :  { %1931 = vmatprep.subr.bf16.mxu0 %v2382_v42 }
 0x207   :  { %v2514_v6 = vpop.f32.mrb[0].mxu1 }
 0x208   :  { %769 = vmax.xlane.f32.xlu0 %v2514_v6  ;;  %v2517_v18 = vpop.f32.mrb[1].mxu1 }
 0x209   :  { %v551_v30 = vmax.f32 %v2517_v18, %v2514_v6  ;;  %v2521_v37 = vpop.f32.mrb[2].mxu1 }
 0x20a   :  { %771 = vmax.xlane.f32.xlu1 %v2521_v37  ;;  %v2524_v38 = vpop.f32.mrb[3].mxu1 }
 0x20b   :  { %v552_v44 = vmax.f32 %v2524_v38, %v2521_v37 }
 0x20c   :  { %765 = vmax.xlane.f32.xlu0 %v2517_v18 }
 0x20f   :  { %v2529_v48 = vpop.f32.mrb[4].mxu1 }
 0x210   :  { %767 = vmax.xlane.f32.xlu0 %v2524_v38  ;;  %v2532_v51 = vpop.f32.mrb[5].mxu1 }
 0x211   :  { %v553_v21 = vmax.f32 %v551_v30, %v2532_v51  ;;  %v2535_v22 = vpop.f32.mrb[6].mxu1 }
 0x212   :  { %779 = vmax.xlane.f32.xlu1 %v2535_v22  ;;  %v2538_v23 = vpop.f32.mrb[7].mxu1 }
 0x213   :  { %v554_v25 = vmax.f32 %v552_v44, %v2538_v23  ;;  %v555_v26 = vmax.f32 %v553_v21, %v2529_v48 }
 0x214   :  { %777 = vmax.xlane.f32.xlu0 %v2529_v48 }
 0x215   :  { %v556_v27 = vmax.f32 %v554_v25, %v2535_v22 }
 0x216   :  { %775 = vmax.xlane.f32.xlu1 %v2538_v23 }
 0x217   :  { %v2545_v32 = vpop.f32.mrb[8].mxu1 }
 0x218   :  { %773 = vmax.xlane.f32.xlu0 %v2532_v51  ;;  %v2548_v33 = vpop.f32.mrb[9].mxu1 }
 0x219   :  { %v557_v34 = vmax.f32 %v555_v26, %v2548_v33  ;;  %v2551_v36 = vpop.f32.mrb[10].mxu1 }
 0x21a   :  { %787 = vmax.xlane.f32.xlu1 %v2551_v36  ;;  %v2554_v13 = vpop.f32.mrb[11].mxu1 }
 0x21b   :  { %v558_v39 = vmax.f32 %v556_v27, %v2554_v13  ;;  %v559_v40 = vmax.f32 %v557_v34, %v2545_v32 }
 0x21c   :  { %785 = vmax.xlane.f32.xlu0 %v2545_v32 }
 0x21d   :  { %v560_v41 = vmax.f32 %v558_v39, %v2551_v36 }
 0x21e   :  { %783 = vmax.xlane.f32.xlu1 %v2554_v13 }
 0x21f   :  { %v2561_v43 = vpop.f32.mrb[12].mxu1 }
 0x220   :  { %3222 = vst [vmem:[#allocation31_spill] sm:$0xff] %v2561_v43  ;;  %781 = vmax.xlane.f32.xlu0 %v2548_v33  ;;  %v2564_v49 = vpop.f32.mrb[13].mxu1 }
 0x221   :  { %v561_v45 = vmax.f32 %v559_v40, %v2564_v49  ;;  %v2567_v50 = vpop.f32.mrb[14].mxu1 }
 0x222   :  { %795 = vmax.xlane.f32.xlu1 %v2567_v50  ;;  %v2570_v52 = vpop.f32.mrb[15].mxu1 }
 0x223   :  { %v563_v53 = vmax.f32 %v561_v45, %v2561_v43  ;;  %v562_v55 = vmax.f32 %v560_v41, %v2570_v52 }
 0x224   :  { %793 = vmax.xlane.f32.xlu0 %v2561_v43 }
 0x225   :  { %v564_v60 = vmax.f32 %v562_v55, %v2567_v50 }
 0x226   :  { %791 = vmax.xlane.f32.xlu1 %v2570_v52 }
 0x227   :  { %v565_v46 = vmax.f32 %v563_v53, %v564_v60  ;;  %v2577_v62 = vpop.f32.mrb[32].mxu0 }
 0x228   :  { %789 = vmax.xlane.f32.xlu0 %v2564_v49  ;;  %v2580_v57 = vpop.f32.mrb[33].mxu0 }
 0x229   :  { %v566_v63 = vrot.slane %v565_v46, 4  ;;  %v572_v1 = vmax.f32 %v2580_v57, %v2577_v62  ;;  %v2584_v2 = vpop.f32.mrb[34].mxu0 }
 0x22a   :  { %3223 = vst [vmem:[#allocation32_spill] sm:$0xff] %v2584_v2  ;;  %797 = vmax.xlane.f32.xlu1 %v2580_v57  ;;  %v2587_v8 = vpop.f32.mrb[35].mxu0 }
 0x22b   :  { %3224 = vst [vmem:[#allocation33_spill] sm:$0xff] %v2587_v8  ;;  %v567_v9 = vmax.f32 %v565_v46, %v566_v63  ;;  %v573_v58 = vmax.f32 %v2587_v8, %v2584_v2 }
 0x22c   :  { %801 = vmax.xlane.f32.xlu0 %v2577_v62 }
 0x22d   :  { %v568_v19 = vrot.slane %v567_v9, 2 }
 0x22e   :  { %803 = vmax.xlane.f32.xlu1 %v2584_v2 }
 0x22f   :  { %v569_v10 = vmax.f32 %v567_v9, %v568_v19  ;;  %v2593_v11 = vpop.f32.mrb[36].mxu0 }
 0x230   :  { %809 = vmax.xlane.f32.xlu0 %v2593_v11  ;;  %v2596_v12 = vpop.f32.mrb[37].mxu0 }
 0x231   :  { %v570_v14 = vrot.slane %v569_v10, 1  ;;  %v574_v5 = vmax.f32 %v572_v1, %v2596_v12  ;;  %v2599_v29 = vpop.f32.mrb[38].mxu0 }
 0x232   :  { %3225 = vst [vmem:[#allocation34_spill] sm:$0xff] %v2599_v29  ;;  %799 = vmax.xlane.f32.xlu1 %v2587_v8  ;;  %v2602_v15 = vpop.f32.mrb[39].mxu0 }
 0x233   :  { %3226 = vst [vmem:[#allocation35_spill] sm:$0xff] %v2602_v15  ;;  %v2604_v16 = vmax.f32 %v569_v10, %v570_v14  ;;  %v575_v30 = vmax.f32 %v573_v58, %v2602_v15  ;;  %v576_v44 = vmax.f32 %v574_v5, %v2593_v11 }
 0x234   :  { %805 = vmax.xlane.f32.xlu0 %v2596_v12 }
 0x235   :  { %v577_v25 = vmax.f32 %v575_v30, %v2599_v29  ;;  %v593_v26 = vsub.f32 %v2517_v18, %v2604_v16  ;;  %v594_v27 = vsub.f32 %v2524_v38, %v2604_v16  ;;  %v595_v34 = vsub.f32 %v2514_v6, %v2604_v16 }
 0x236   :  { %811 = vmax.xlane.f32.xlu1 %v2599_v29  ;;  %v596_v39 = vsub.f32 %v2521_v37, %v2604_v16  ;;  %v597_v40 = vsub.f32 %v2532_v51, %v2604_v16  ;;  %v598_v41 = vsub.f32 %v2538_v23, %v2604_v16  ;;  %v599_v53 = vsub.f32 %v2529_v48, %v2604_v16 }
 0x237   :  { %v2625_v45 = vpop.f32.mrb[40].mxu0  ;;  %v600_v55 = vsub.f32 %v2535_v22, %v2604_v16  ;;  %v601_v60 = vsub.f32 %v2548_v33, %v2604_v16  ;;  %v602_v63 = vsub.f32 %v2554_v13, %v2604_v16  ;;  %v603_v1 = vsub.f32 %v2545_v32, %v2604_v16 }
 0x238   :  { %817 = vmax.xlane.f32.xlu0 %v2625_v45  ;;  %v2634_v46 = vpop.f32.mrb[41].mxu0  ;;  %v604_v9 = vsub.f32 %v2551_v36, %v2604_v16  ;;  %v605_v58 = vsub.f32 %v2564_v49, %v2604_v16  ;;  %v625_v21 = vmul.f32 1.442695, %v593_v26  ;;  %v627_v3 = vmul.f32 1.442695, %v594_v27 }
 0x239   :  { %v578_v19 = vmax.f32 %v576_v44, %v2634_v46  ;;  %v2645_v10 = vpop.f32.mrb[42].mxu0  ;;  %v629_v54 = vmul.f32 1.442695, %v595_v34  ;;  %v631_v14 = vmul.f32 1.442695, %v596_v39 }
 0x23a   :  { %3227 = vst [vmem:[#allocation36_spill] sm:$0xff] %v2645_v10  ;;  %807 = vmax.xlane.f32.xlu1 %v2602_v15  ;;  %v2652_v30 = vpop.f32.mrb[43].mxu0  ;;  %1970 = vpow2.f32 %v625_v21  ;;  %v633_v17 = vmul.f32 1.442695, %v597_v40  ;;  %v635_v21 = vmul.f32 1.442695, %v598_v41 }
 0x23b   :  { %3228 = vst [vmem:[#allocation37_spill] sm:$0xff] %v2652_v30  ;;  %v579_v0 = vmax.f32 %v577_v25, %v2652_v30  ;;  %v580_v61 = vmax.f32 %v578_v19, %v2625_v45  ;;  %1972 = vpow2.f32 %v627_v3  ;;  %v645_v4 = vmul.f32 1.442695, %v603_v1 }
 0x23c   :  { %813 = vmax.xlane.f32.xlu0 %v2634_v46  ;;  %1974 = vpow2.f32 %v629_v54  ;;  %v637_v54 = vmul.f32 1.442695, %v599_v53  ;;  %v649_v42 = vmul.f32 1.442695, %v605_v58 }
 0x23d   :  { %v581_v44 = vmax.f32 %v579_v0, %v2645_v10  ;;  %1976 = vpow2.f32 %v631_v14  ;;  %v641_v14 = vmul.f32 1.442695, %v601_v60 }
 0x23e   :  { %819 = vmax.xlane.f32.xlu1 %v2645_v10  ;;  %1978 = vpow2.f32 %v633_v17 }
 0x23f   :  { %v2659_v5 = vpop.f32.mrb[44].mxu0  ;;  %1980 = vpow2.f32 %v635_v21 }
 0x240   :  { %3229 = vst [vmem:[#allocation38_spill] sm:$0xff] %v2659_v5  ;;  %825 = vmax.xlane.f32.xlu0 %v2659_v5  ;;  %v2662_v26 = vpop.f32.mrb[45].mxu0  ;;  %1982 = vpow2.f32 %v637_v54 }
 0x241   :  { %3230 = vst [vmem:[#allocation39_spill] sm:$0xff] %v2662_v26  ;;  %v582_v25 = vmax.f32 %v580_v61, %v2662_v26  ;;  %v2665_v27 = vpop.f32.mrb[46].mxu0  ;;  %v639_v61 = vmul.f32 1.442695, %v600_v55 }
 0x242   :  { %3231 = vst [vmem:[#allocation40_spill] sm:$0xff] %v2665_v27  ;;  %815 = vmax.xlane.f32.xlu1 %v2652_v30  ;;  %v2668_v0 = vpop.f32.mrb[47].mxu0 }
 0x243   :  { %3232 = vst [vmem:[#allocation41_spill] sm:$0xff] %v2668_v0  ;;  %v584_v3 = vmax.f32 %v582_v25, %v2659_v5  ;;  %v583_v34 = vmax.f32 %v581_v44, %v2668_v0  ;;  %1984 = vpow2.f32 %v639_v61  ;;  %v643_v25 = vmul.f32 1.442695, %v602_v63 }
 0x244   :  { %821 = vmax.xlane.f32.xlu0 %v2662_v26  ;;  %v2674_v40 = vpop.eup %1970  ;;  %1986 = vpow2.f32 %v641_v14 }
 0x245   :  { %v585_v39 = vmax.f32 %v583_v34, %v2665_v27  ;;  %v2677_v41 = vpop.eup %1972  ;;  %1988 = vpow2.f32 %v643_v25 }
 0x246   :  { %827 = vmax.xlane.f32.xlu1 %v2665_v27  ;;  %v689_v44 = vadd.f32 %v2677_v41, %v2674_v40  ;;  %v2681_v17 = vpop.eup %1974  ;;  %1990 = vpow2.f32 %v645_v4  ;;  %v3234_v4 = vsub.f32 %v2561_v43, %v2604_v16 }
 0x247   :  { %v586_v19 = vmax.f32 %v584_v3, %v585_v39  ;;  %v2685_v21 = vpop.eup %1976  ;;  %v647_v39 = vmul.f32 1.442695, %v604_v9 }
 0x248   :  { %v690_v55 = vadd.f32 %v2681_v17, %v689_v44  ;;  %v2688_v60 = vpop.eup %1978  ;;  %v3233_v44 = vsub.f32 %v2570_v52, %v2604_v16  ;;  %v653_v58 = vmul.f32 1.442695, %v3234_v4 }
 0x249   :  { %v587_v53 = vrot.slane %v586_v19, 4  ;;  %v2691_v61 = vpop.eup %1980  ;;  %1992 = vpow2.f32 %v647_v39 }
 0x24a   :  { %823 = vmax.xlane.f32.xlu1 %v2668_v0  ;;  %v691_v3 = vadd.f32 %v2685_v21, %v690_v55  ;;  %v2697_v14 = vpop.eup %1982  ;;  %1994 = vpow2.f32 %v649_v42 }
 0x24b   :  { %v588_v34 = vmax.f32 %v586_v19, %v587_v53  ;;  %v651_v19 = vmul.f32 1.442695, %v3233_v44 }
 0x24c   :  { %v692_v56 = vadd.f32 %v2688_v60, %v691_v3 }
 0x24d   :  { %v589_v54 = vrot.slane %v588_v34, 2  ;;  %v2700_v9 = vpop.eup %1984  ;;  %1996 = vpow2.f32 %v651_v19 }
 0x24e   :  { %v693_v1 = vadd.f32 %v2691_v61, %v692_v56  ;;  %1998 = vpow2.f32 %v653_v58 }
 0x24f   :  { %v590_v63 = vmax.f32 %v588_v34, %v589_v54  ;;  %v3235_v34 = vsub.f32 %v2567_v50, %v2604_v16  ;;  %v2711_v54 = vpop.eup %1986 }
 0x250   :  { %v694_v25 = vadd.f32 %v2697_v14, %v693_v1 }
 0x251   :  { %v591_v53 = vrot.slane %v590_v63, 1  ;;  %v655_v56 = vmul.f32 1.442695, %v3235_v34 }
 0x252   :  { %v695_v3 = vadd.f32 %v2700_v9, %v694_v25  ;;  %v2728_v25 = vpop.eup %1988 }
 0x253   :  { %v2702_v55 = vmax.f32 %v590_v63, %v591_v53  ;;  %2000 = vpow2.f32 %v655_v56 }
 0x254   :  { %v696_v19 = vadd.f32 %v2711_v54, %v695_v3 }
 0x255   :  { %v609_v63 = vsub.f32 %v2580_v57, %v2702_v55  ;;  %v610_v42 = vsub.f32 %v2587_v8, %v2702_v55  ;;  %v611_v44 = vsub.f32 %v2577_v62, %v2702_v55  ;;  %v612_v16 = vsub.f32 %v2584_v2, %v2702_v55 }
 0x256   :  { %v613_v1 = vsub.f32 %v2596_v12, %v2702_v55  ;;  %v614_v53 = vsub.f32 %v2602_v15, %v2702_v55  ;;  %v615_v4 = vsub.f32 %v2593_v11, %v2702_v55  ;;  %v616_v34 = vsub.f32 %v2599_v29, %v2702_v55  ;;  %v2743_v15 = vpop.eup %1990 }
 0x257   :  { %v617_v3 = vsub.f32 %v2634_v46, %v2702_v55  ;;  %v697_v39 = vadd.f32 %v2728_v25, %v696_v19  ;;  %v618_v31 = vsub.f32 %v2652_v30, %v2702_v55  ;;  %v619_v20 = vsub.f32 %v2625_v45, %v2702_v55  ;;  %v2752_v47 = vpop.eup %1992 }
 0x258   :  { %v620_v58 = vsub.f32 %v2645_v10, %v2702_v55  ;;  %v621_v7 = vsub.f32 %v2662_v26, %v2702_v55  ;;  %v657_v8 = vmul.f32 1.442695, %v609_v63  ;;  %v659_v59 = vmul.f32 1.442695, %v610_v42  ;;  %v2755_v56 = vpop.eup %1994 }
 0x259   :  { %v698_v30 = vadd.f32 %v2743_v15, %v697_v39  ;;  %v661_v2 = vmul.f32 1.442695, %v611_v44  ;;  %v663_v10 = vmul.f32 1.442695, %v612_v16  ;;  %v665_v28 = vmul.f32 1.442695, %v613_v1  ;;  %v2757_v24 = vpop.eup %1996 }
 0x25a   :  { %2002 = vpow2.f32 %v657_v8  ;;  %v667_v39 = vmul.f32 1.442695, %v614_v53  ;;  %v2761_v42 = vpop.eup %1998  ;;  %v669_v44 = vmul.f32 1.442695, %v615_v4  ;;  %v673_v1 = vmul.f32 1.442695, %v617_v3 }
 0x25b   :  { %v699_v35 = vadd.f32 %v2752_v47, %v698_v30  ;;  %2004 = vpow2.f32 %v659_v59  ;;  %v671_v59 = vmul.f32 1.442695, %v616_v34  ;;  %v677_v34 = vmul.f32 1.442695, %v619_v20 }
 0x25c   :  { %2006 = vpow2.f32 %v661_v2  ;;  %v681_v43 = vmul.f32 1.442695, %v621_v7 }
 0x25d   :  { %v700_v29 = vadd.f32 %v2755_v56, %v699_v35  ;;  %2008 = vpow2.f32 %v663_v10  ;;  %v2764_v8 = vpop.eup %2000 }
 0x25e   :  { %2010 = vpow2.f32 %v665_v28 }
 0x25f   :  { %v701_v63 = vadd.f32 %v2757_v24, %v700_v29  ;;  %2012 = vpow2.f32 %v667_v39  ;;  %v675_v29 = vmul.f32 1.442695, %v618_v31 }
 0x260   :  { %2014 = vpow2.f32 %v669_v44 }
 0x261   :  { %v702_v30 = vadd.f32 %v2761_v42, %v701_v63  ;;  %2016 = vpow2.f32 %v671_v59 }
 0x262   :  { %2018 = vpow2.f32 %v673_v1 }
 0x263   :  { %v703_v16 = vadd.f32 %v2764_v8, %v702_v30  ;;  %2020 = vpow2.f32 %v675_v29  ;;  %v679_v30 = vmul.f32 1.442695, %v620_v58 }
 0x264   :  { %v2767_v35 = vpop.eup %2002  ;;  %2022 = vpow2.f32 %v677_v34 }
 0x265   :  { %v704_v2 = vrot.slane %v703_v16, 4  ;;  %v2769_v10 = vpop.eup %2004  ;;  %2024 = vpow2.f32 %v679_v30 }
 0x266   :  { %v2771_v53 = vpop.eup %2006  ;;  %v710_v4 = vadd.f32 %v2769_v10, %v2767_v35 }
 0x267   :  { %v705_v28 = vadd.f32 %v704_v2, %v703_v16  ;;  %v2775_v63 = vpop.eup %2008 }
 0x268   :  { %v711_v3 = vadd.f32 %v2771_v53, %v710_v4  ;;  %v2778_v44 = vpop.eup %2010 }
 0x269   :  { %v706_v39 = vrot.slane %v705_v28, 2  ;;  %v2781_v59 = vpop.eup %2012 }
 0x26a   :  { %v712_v31 = vadd.f32 %v2775_v63, %v711_v3  ;;  %v2784_v26 = vpop.eup %2014 }
 0x26b   :  { %v707_v19 = vadd.f32 %v706_v39, %v705_v28  ;;  %v2787_v4 = vpop.eup %2016  ;;  %v3236_v28 = vsub.f32 %v2668_v0, %v2702_v55 }
 0x26c   :  { %v713_v2 = vadd.f32 %v2778_v44, %v712_v31  ;;  %v2790_v29 = vpop.eup %2018 }
 0x26d   :  { %v708_v16 = vrot.slane %v707_v19, 1  ;;  %v683_v34 = vmul.f32 1.442695, %v3236_v28  ;;  %v2796_v3 = vpop.eup %2020 }
 0x26e   :  { %v714_v1 = vadd.f32 %v2781_v59, %v713_v2  ;;  %v2802_v31 = vpop.eup %2022 }
 0x26f   :  { %v709_v20 = vadd.f32 %v708_v16, %v707_v19  ;;  %v3237_v19 = vsub.f32 %v2659_v5, %v2702_v55  ;;  %v3238_v16 = vsub.f32 %v2665_v27, %v2702_v55 }
 0x270   :  { %v715_v58 = vadd.f32 %v2784_v26, %v714_v1  ;;  %v2808_v1 = vpop.eup %2024 }
 0x271   :  { %2026 = vrcp.f32 %v709_v20  ;;  %v685_v30 = vmul.f32 1.442695, %v3237_v19  ;;  %v687_v2 = vmul.f32 1.442695, %v3238_v16 }
 0x272   :  { %v716_v39 = vadd.f32 %v2787_v4, %v715_v58  ;;  %2028 = vpow2.f32 %v681_v43 }
 0x273   :  { %2030 = vpow2.f32 %v683_v34 }
 0x274   :  { %v717_v7 = vadd.f32 %v2790_v29, %v716_v39  ;;  %2032 = vpow2.f32 %v685_v30 }
 0x275   :  { %2034 = vpow2.f32 %v687_v2 }
 0x276   :  { %v718_v20 = vadd.f32 %v2796_v3, %v717_v7 }
 0x278   :  { %v719_v43 = vadd.f32 %v2802_v31, %v718_v20 }
 0x27a   :  { %v720_v28 = vadd.f32 %v2808_v1, %v719_v43 }
 0x27b   :  { %v2027_v58 = vpop.eup %2026 }
 0x27c   :  { %v733_v39 = vmul.f32 %v2027_v58, %v2674_v40  ;;  %v734_v19 = vmul.f32 %v2027_v58, %v2677_v41  ;;  %v735_v34 = vmul.f32 %v2027_v58, %v2681_v17  ;;  %v736_v55 = vmul.f32 %v2027_v58, %v2685_v21  ;;  %v2820_v2 = vpop.eup %2028 }
 0x27d   :  { %v737_v16 = vmul.f32 %v2027_v58, %v2688_v60  ;;  %v738_v7 = vmul.f32 %v2027_v58, %v2691_v61  ;;  %v739_v30 = vmul.f32 %v2027_v58, %v2697_v14  ;;  %v740_v20 = vmul.f32 %v2027_v58, %v2700_v9  ;;  %v2826_v5 = vpop.eup %2030 }
 0x27e   :  { %v1053_v27 = vpack.c.bf16 %v734_v19, %v733_v39  ;;  %v1054_v43 = vpack.c.bf16 %v736_v55, %v735_v34  ;;  %v741_v40 = vmul.f32 %v2027_v58, %v2711_v54  ;;  %v742_v41 = vmul.f32 %v2027_v58, %v2728_v25  ;;  %v2833_v34 = vpop.eup %2032 }
 0x27f   :  { %v1055_v0 = vpack.c.bf16 %v738_v7, %v737_v16  ;;  %v1056_v17 = vpack.c.bf16 %v740_v20, %v739_v30  ;;  %v743_v21 = vmul.f32 %v2027_v58, %v2743_v15  ;;  %v744_v60 = vmul.f32 %v2027_v58, %v2752_v47  ;;  %v2836_v16 = vpop.eup %2034 }
 0x280   :  { %1069 = vxpose.xlu0.c.b16.start [1/8] %v1053_v27, 128  ;;  %v1057_v61 = vpack.c.bf16 %v742_v41, %v741_v40  ;;  %v745_v14 = vmul.f32 %v2027_v58, %v2755_v56  ;;  %v746_v9 = vmul.f32 %v2027_v58, %v2757_v24  ;;  %v747_v39 = vmul.f32 %v2027_v58, %v2761_v42 }
 0x281   :  { %v1058_v19 = vpack.c.bf16 %v744_v60, %v743_v21  ;;  %v748_v54 = vmul.f32 %v2027_v58, %v2764_v8  ;;  %v721_v25 = vadd.f32 %v2820_v2, %v720_v28 }
 0x282   :  { %v1059_v15 = vpack.c.bf16 %v746_v9, %v745_v14 }
 0x283   :  { %v1060_v55 = vpack.c.bf16 %v748_v54, %v747_v39  ;;  %v722_v47 = vadd.f32 %v2826_v5, %v721_v25 }
 0x284   :  { %1070 = vxpose.xlu0.c.b16.cont [2/8] %v1054_v43, 128 }
 0x285   :  { %v723_v27 = vadd.f32 %v2833_v34, %v722_v47 }
 0x287   :  { %v724_v24 = vadd.f32 %v2836_v16, %v723_v27 }
 0x288   :  { %1071 = vxpose.xlu0.c.b16.cont [3/8] %v1055_v0, 128 }
 0x289   :  { %v725_v56 = vrot.slane %v724_v24, 4 }
 0x28b   :  { %v726_v42 = vadd.f32 %v725_v56, %v724_v24 }
 0x28c   :  { %1072 = vxpose.xlu0.c.b16.cont [4/8] %v1056_v17, 128 }
 0x28d   :  { %v727_v8 = vrot.slane %v726_v42, 2 }
 0x28f   :  { %v728_v58 = vadd.f32 %v727_v8, %v726_v42 }
 0x290   :  { %1073 = vxpose.xlu0.c.b16.cont [5/8] %v1057_v61, 128 }
 0x291   :  { %v729_v28 = vrot.slane %v728_v58, 1 }
 0x293   :  { %v730_v7 = vadd.f32 %v729_v28, %v728_v58 }
 0x294   :  { %1074 = vxpose.xlu0.c.b16.cont [6/8] %v1058_v19, 128 }
 0x295   :  { %v770_v30 = vpop.xlane.xlu0 %769  ;;  %2036 = vrcp.f32 %v730_v7 }
 0x296   :  { %v831_v20 = vsub.f32 %v2514_v6, %v770_v30 }
 0x297   :  { %v772_v40 = vpop.xlane.xlu1 %771 }
 0x298   :  { %v832_v43 = vsub.f32 %v2521_v37, %v772_v40  ;;  %v865_v41 = vmul.f32 1.442695, %v831_v20  ;;  %1075 = vxpose.xlu0.c.b16.cont [7/8] %v1059_v15, 128 }
 0x299   :  { %v766_v21 = vpop.xlane.xlu0 %765 }
 0x29a   :  { %v867_v0 = vmul.f32 1.442695, %v832_v43  ;;  %v829_v60 = vsub.f32 %v2517_v18, %v766_v21 }
 0x29c   :  { %2038 = vpow2.f32 %v867_v0  ;;  %v861_v17 = vmul.f32 1.442695, %v829_v60  ;;  %1076 = vxpose.xlu0.c.b16.end [8/8] %v1060_v55, 128 }
 0x29d   :  { %2040 = vpow2.f32 %v865_v41  ;;  %v768_v61 = vpop.xlane.xlu0 %767 }
 0x29e   :  { %v830_v14 = vsub.f32 %v2524_v38, %v768_v61  ;;  %2042 = vpow2.f32 %v861_v17 }
 0x29f   :  { %v780_v9 = vpop.xlane.xlu1 %779  ;;  %v2037_v39 = vpop.eup %2036 }
 0x2a0   :  { %v863_v6 = vmul.f32 1.442695, %v830_v14  ;;  %v836_v19 = vsub.f32 %v2535_v22, %v780_v9  ;;  %v2846_v54 = vmul.f32 %v2037_v39, %v2767_v35  ;;  %v2849_v25 = vmul.f32 %v2037_v39, %v2769_v10 }
 0x2a1   :  { %v778_v37 = vpop.xlane.xlu0 %777  ;;  %v2852_v18 = vmul.f32 %v2037_v39, %v2771_v53  ;;  %v2855_v15 = vmul.f32 %v2037_v39, %v2775_v63  ;;  %v2859_v47 = vmul.f32 %v2037_v39, %v2778_v44  ;;  %v2866_v53 = vmul.f32 %v2037_v39, %v2781_v59 }
 0x2a2   :  { %2044 = vpow2.f32 %v863_v6  ;;  %v875_v38 = vmul.f32 1.442695, %v836_v19  ;;  %v835_v55 = vsub.f32 %v2529_v48, %v778_v37  ;;  %v1061_v35 = vpack.c.bf16 %v2849_v25, %v2846_v54  ;;  %v3244_v54 = vld [vmem:[#allocation17_spill] sm:$0xff] }
 0x2a3   :  { %v776_v22 = vpop.xlane.xlu1 %775  ;;  %v1062_v10 = vpack.c.bf16 %v2855_v15, %v2852_v18  ;;  %v2869_v63 = vmul.f32 %v2037_v39, %v2784_v26  ;;  %v2873_v44 = vmul.f32 %v2037_v39, %v2787_v4  ;;  %v1063_v56 = vpack.c.bf16 %v2866_v53, %v2859_v47  ;;  %v3245_v47 = vld [vmem:[#allocation19_spill] sm:$0xff] }
 0x2a4   :  { %2046 = vpow2.f32 %v875_v38  ;;  %v873_v27 = vmul.f32 1.442695, %v835_v55  ;;  %v834_v48 = vsub.f32 %v2538_v23, %v776_v22  ;;  %v2878_v42 = vmul.f32 %v2037_v39, %v2790_v29 }
 0x2a5   :  { %v774_v24 = vpop.xlane.xlu0 %773  ;;  %v2881_v59 = vmul.f32 %v2037_v39, %v2796_v3  ;;  %v2884_v26 = vmul.f32 %v2037_v39, %v2802_v31  ;;  %v1064_v58 = vpack.c.bf16 %v2873_v44, %v2869_v63  ;;  %v2897_v3 = vmul.f32 %v2037_v39, %v2808_v1  ;;  %v3246_v44 = vld [vmem:[#allocation32_spill] sm:$0xff] }
 0x2a6   :  { %v2886_v8 = vpop.eup %2038  ;;  %2048 = vpow2.f32 %v873_v27  ;;  %v871_v23 = vmul.f32 1.442695, %v834_v48  ;;  %v833_v4 = vsub.f32 %v2532_v51, %v774_v24  ;;  %v2900_v31 = vmul.f32 %v2037_v39, %v2820_v2 }
 0x2a7   :  { %v2891_v28 = vpop.eup %2040  ;;  %v788_v7 = vpop.xlane.xlu1 %787  ;;  %931 = vadd.xlane.f32.xlu1 %v2886_v8  ;;  %v1065_v29 = vpack.c.bf16 %v2881_v59, %v2878_v42  ;;  %v2903_v30 = vmul.f32 %v2037_v39, %v2826_v5  ;;  %v2907_v40 = vmul.f32 %v2037_v39, %v2833_v34  ;;  %v1066_v41 = vpack.c.bf16 %v2897_v3, %v2884_v26  ;;  %v3247_v59 = vld [vmem:[#allocation21_spill] sm:$0xff] }
 0x2a8   :  { %v869_v51 = vmul.f32 1.442695, %v833_v4  ;;  %v840_v20 = vsub.f32 %v2551_v36, %v788_v7  ;;  %2050 = vpow2.f32 %v871_v23  ;;  %v2914_v2 = vmul.f32 %v2037_v39, %v2836_v16  ;;  %v2916_v21 = vpop.eup %2042 }
 0x2a9   :  { %v786_v43 = vpop.xlane.xlu0 %785  ;;  %v1067_v1 = vpack.c.bf16 %v2903_v30, %v2900_v31  ;;  %929 = vadd.xlane.f32.xlu0 %v2891_v28  ;;  %v3249_v31 = vld [vmem:[#allocation34_spill] sm:$0xff] }
 0x2aa   :  { %2052 = vpow2.f32 %v869_v51  ;;  %v883_v36 = vmul.f32 1.442695, %v840_v20  ;;  %v839_v5 = vsub.f32 %v2545_v32, %v786_v43  ;;  %v1068_v0 = vpack.c.bf16 %v2914_v2, %v2907_v40 }
 0x2ab   :  { %v784_v34 = vpop.xlane.xlu1 %783 }
 0x2ac   :  { %v2922_v60 = vpop.eup %2044  ;;  %v881_v17 = vmul.f32 1.442695, %v839_v5  ;;  %v838_v61 = vsub.f32 %v2554_v13, %v784_v34  ;;  %2054 = vpow2.f32 %v883_v36 }
 0x2ad   :  { %v782_v16 = vpop.xlane.xlu0 %781  ;;  %927 = vadd.xlane.f32.xlu1 %v2922_v60  ;;  %925 = vadd.xlane.f32.xlu0 %v2916_v21 }
 0x2ae   :  { %v2926_v14 = vpop.eup %2046  ;;  %2056 = vpow2.f32 %v881_v17  ;;  %v879_v9 = vmul.f32 1.442695, %v838_v61  ;;  %v837_v32 = vsub.f32 %v2548_v33, %v782_v16 }
 0x2af   :  { %v2930_v39 = vpop.xlane.xlu1 %795 }
 0x2b0   :  { %v2932_v6 = vpop.eup %2048  ;;  %v877_v19 = vmul.f32 1.442695, %v837_v32  ;;  %v844_v13 = vsub.f32 %v2567_v50, %v2930_v39  ;;  %2058 = vpow2.f32 %v879_v9 }
 0x2b1   :  { %v794_v37 = vpop.xlane.xlu0 %793  ;;  %939 = vadd.xlane.f32.xlu1 %v2926_v14  ;;  %937 = vadd.xlane.f32.xlu0 %v2932_v6 }
 0x2b2   :  { %2060 = vpow2.f32 %v877_v19  ;;  %v2938_v38 = vpop.eup %2050 }
 0x2b3   :  { %v2940_v55 = vpop.xlane.xlu1 %791 }
 0x2b4   :  { %v2942_v33 = vpop.eup %2052  ;;  %v842_v22 = vsub.f32 %v2570_v52, %v2940_v55  ;;  %v3251_v55 = vld [vmem:[#allocation35_spill] sm:$0xff] }
 0x2b5   :  { %v790_v27 = vpop.xlane.xlu0 %789  ;;  %935 = vadd.xlane.f32.xlu1 %v2938_v38  ;;  %933 = vadd.xlane.f32.xlu0 %v2942_v33 }
 0x2b6   :  { %v841_v48 = vsub.f32 %v2564_v49, %v790_v27  ;;  %v2949_v24 = vpop.eup %2054  ;;  %v887_v63 = vmul.f32 1.442695, %v842_v22 }
 0x2b7   :  { %v798_v23 = vpop.xlane.xlu1 %797 }
 0x2b8   :  { %v2951_v4 = vpop.eup %2056  ;;  %v885_v7 = vmul.f32 1.442695, %v841_v48  ;;  %v845_v20 = vsub.f32 %v2580_v57, %v798_v23 }
 0x2b9   :  { %v802_v51 = vpop.xlane.xlu0 %801  ;;  %947 = vadd.xlane.f32.xlu1 %v2949_v24  ;;  %945 = vadd.xlane.f32.xlu0 %v2951_v4 }
 0x2ba   :  { %2062 = vpow2.f32 %v885_v7  ;;  %v847_v43 = vsub.f32 %v2577_v62, %v802_v51  ;;  %v2957_v36 = vpop.eup %2058  ;;  %v893_v17 = vmul.f32 1.442695, %v845_v20  ;;  %v3239_v20 = vld [vmem:[#allocation31_spill] sm:$0xff] }
 0x2bc   :  { %v2959_v49 = vpop.eup %2060  ;;  %v897_v5 = vmul.f32 1.442695, %v847_v43  ;;  %v843_v43 = vsub.f32 %v3239_v20, %v794_v37 }
 0x2bd   :  { %v810_v34 = vpop.xlane.xlu0 %809  ;;  %943 = vadd.xlane.f32.xlu1 %v2957_v36  ;;  %941 = vadd.xlane.f32.xlu0 %v2959_v49 }
 0x2be   :  { %2064 = vpow2.f32 %v897_v5  ;;  %v851_v61 = vsub.f32 %v2593_v11, %v810_v34 }
 0x2bf   :  { %2066 = vpow2.f32 %v893_v17  ;;  %v889_v17 = vmul.f32 1.442695, %v843_v43  ;;  %v3242_v43 = vld [vmem:[#allocation15_spill] sm:$0xff] }
 0x2c0   :  { %v905_v57 = vmul.f32 1.442695, %v851_v61  ;;  %v3240_v61 = vld [vmem:[#allocation39_spill] sm:$0xff] }
 0x2c1   :  { %v806_v16 = vpop.xlane.xlu0 %805 }
 0x2c2   :  { %v849_v62 = vsub.f32 %v2596_v12, %v806_v16  ;;  %2068 = vpow2.f32 %v905_v57 }
 0x2c4   :  { %v2965_v9 = vpop.eup %2062  ;;  %v901_v19 = vmul.f32 1.442695, %v849_v62 }
 0x2c5   :  { %v818_v32 = vpop.xlane.xlu0 %817  ;;  %949 = vadd.xlane.f32.xlu0 %v2965_v9 }
 0x2c6   :  { %v855_v27 = vsub.f32 %v2625_v45, %v818_v32  ;;  %2070 = vpow2.f32 %v901_v19 }
 0x2c8   :  { %v2969_v48 = vpop.eup %2064  ;;  %v913_v11 = vmul.f32 1.442695, %v855_v27 }
 0x2c9   :  { %v814_v23 = vpop.xlane.xlu0 %813  ;;  %961 = vadd.xlane.f32.xlu0 %v2969_v48  ;;  %v2973_v51 = vpop.eup %2066 }
 0x2ca   :  { %v853_v7 = vsub.f32 %v2634_v46, %v814_v23  ;;  %2072 = vpow2.f32 %v913_v11  ;;  %v3241_v46 = vld [vmem:[#allocation38_spill] sm:$0xff] }
 0x2cc   :  { %v909_v5 = vmul.f32 1.442695, %v853_v7  ;;  %v2977_v34 = vpop.eup %2068 }
 0x2cd   :  { %v826_v12 = vpop.xlane.xlu0 %825  ;;  %957 = vadd.xlane.f32.xlu0 %v2973_v51 }
 0x2ce   :  { %2074 = vpow2.f32 %v909_v5  ;;  %v859_v62 = vsub.f32 %v3241_v46, %v826_v12  ;;  %v3243_v5 = vld [vmem:[#allocation16_spill] sm:$0xff] }
 0x2cf   :  { %2076 = vpow2.f32 %v889_v17  ;;  %v804_v17 = vpop.xlane.xlu1 %803 }
 0x2d0   :  { %v2981_v57 = vpop.eup %2070  ;;  %v921_v19 = vmul.f32 1.442695, %v859_v62 }
 0x2d1   :  { %969 = vadd.xlane.f32.xlu0 %v2977_v34  ;;  %v822_v45 = vpop.xlane.xlu0 %821 }
 0x2d2   :  { %v857_v16 = vsub.f32 %v3240_v61, %v822_v45 }
 0x2d3   :  { %v800_v18 = vpop.xlane.xlu1 %799 }
 0x2d4   :  { %v917_v32 = vmul.f32 1.442695, %v857_v16  ;;  %v2985_v37 = vpop.eup %2072  ;;  %v3252_v16 = vld [vmem:[#allocation36_spill] sm:$0xff] }
 0x2d5   :  { %965 = vadd.xlane.f32.xlu0 %v2981_v57 }
 0x2d6   :  { %2078 = vpow2.f32 %v917_v32  ;;  %v3253_v32 = vld [vmem:[#allocation25_spill] sm:$0xff] }
 0x2d7   :  { %2080 = vpow2.f32 %v921_v19 }
 0x2d8   :  { %v2988_v27 = vpop.eup %2074  ;;  %2082 = vpow2.f32 %v887_v63 }
 0x2d9   :  { %977 = vadd.xlane.f32.xlu0 %v2985_v37  ;;  %v2991_v23 = vpop.eup %2076 }
 0x2dd   :  { %973 = vadd.xlane.f32.xlu0 %v2988_v27 }
 0x2e0   :  { %v2994_v11 = vpop.eup %2078 }
 0x2e1   :  { %953 = vadd.xlane.f32.xlu0 %v2991_v23  ;;  %v2997_v12 = vpop.eup %2080 }
 0x2e5   :  { %981 = vadd.xlane.f32.xlu0 %v2994_v11 }
 0x2e6   :  { %v1077_v7 = vpop.trf.xlu0 }
 0x2e7   :  { %1851 = vmatprep.mubr.bf16.mxu1 %v1077_v7 }
 0x2e9   :  { %985 = vadd.xlane.f32.xlu0 %v2997_v12 }
 0x2ea   :  { %1182 = vxpose.xlu1.c.b16.start [1/8] %v1061_v35, 128  ;;  %v1078_v20 = vpop.trf.xlu0  ;;  %v812_v35 = vpop.xlane.xlu1 %811 }
 0x2eb   :  { %1852 = vmatmul.mubr.bf16.vlgmr.msra.gmra.mrb[16].mxu1 %v1078_v20  ;;  %v852_v30 = vsub.f32 %v3249_v31, %v812_v35  ;;  %v3254_v20 = vld [vmem:[#allocation37_spill] sm:$0xff]  ;;  %v3257_v35 = vld [vmem:[#allocation40_spill] sm:$0xff] }
 0x2ec   :  { %1900 = vmatpush3.bf16.xpose.msra.mxu1 %v3242_v43 }
 0x2ed   :  { %1901 = vmatprep.subr.bf16.mxu1 %v3243_v5 }
 0x2ee   :  { %1183 = vxpose.xlu1.c.b16.cont [2/8] %v1062_v10, 128  ;;  %v1079_v45 = vpop.trf.xlu0  ;;  %v808_v42 = vpop.xlane.xlu1 %807 }
 0x2ef   :  { %1855 = vmatprep.mubr.bf16.mxu1 %v1079_v45  ;;  %v850_v40 = vsub.f32 %v3251_v55, %v808_v42 }
 0x2f1   :  { %v903_v22 = vmul.f32 1.442695, %v850_v40 }
 0x2f2   :  { %1184 = vxpose.xlu1.c.b16.cont [3/8] %v1063_v56, 128  ;;  %v1080_v61 = vpop.trf.xlu0  ;;  %v848_v56 = vsub.f32 %v3246_v44, %v804_v17  ;;  %v820_v3 = vpop.xlane.xlu1 %819 }
 0x2f3   :  { %1856 = vmatmul.mubr.bf16.gmra.mrb[20].mxu1 %v1080_v61  ;;  %v856_v46 = vsub.f32 %v3252_v16, %v820_v3 }
 0x2f4   :  { %1902 = vmatpush3.bf16.xpose.msra.mxu1 %v3243_v5  ;;  %v899_v26 = vmul.f32 1.442695, %v848_v56 }
 0x2f5   :  { %1903 = vmatprep.subr.bf16.mxu1 %v3244_v54  ;;  %v915_v7 = vmul.f32 1.442695, %v856_v46 }
 0x2f6   :  { %1185 = vxpose.xlu1.c.b16.cont [4/8] %v1064_v58, 128  ;;  %v1081_v25 = vpop.trf.xlu0  ;;  %v3248_v58 = vld [vmem:[#allocation33_spill] sm:$0xff]  ;;  %2084 = vpow2.f32 %v899_v26  ;;  %v816_v2 = vpop.xlane.xlu1 %815 }
 0x2f7   :  { %1859 = vmatprep.mubr.bf16.mxu1 %v1081_v25  ;;  %v854_v43 = vsub.f32 %v3254_v20, %v816_v2  ;;  %v891_v25 = vmul.f32 1.442695, %v844_v13 }
 0x2f9   :  { %v911_v45 = vmul.f32 1.442695, %v854_v43 }
 0x2fa   :  { %1186 = vxpose.xlu1.c.b16.cont [5/8] %v1065_v29, 128  ;;  %v1082_v15 = vpop.trf.xlu0  ;;  %v846_v29 = vsub.f32 %v3248_v58, %v800_v18  ;;  %v828_v19 = vpop.xlane.xlu1 %827  ;;  %v3256_v18 = vld [vmem:[#allocation41_spill] sm:$0xff] }
 0x2fb   :  { %1860 = vmatmul.mubr.bf16.gmra.mrb[24].mxu1 %v1082_v15 }
 0x2fc   :  { %1904 = vmatpush3.bf16.xpose.msra.mxu1 %v3244_v54  ;;  %v895_v52 = vmul.f32 1.442695, %v846_v29  ;;  %v3255_v54 = vld [vmem:[#allocation26_spill] sm:$0xff] }
 0x2fd   :  { %1905 = vmatprep.subr.bf16.mxu1 %v3245_v47 }
 0x2fe   :  { %1187 = vxpose.xlu1.c.b16.cont [6/8] %v1066_v41, 128  ;;  %v1083_v10 = vpop.trf.xlu0  ;;  %v3250_v41 = vld [vmem:[#allocation23_spill] sm:$0xff]  ;;  %2086 = vpow2.f32 %v895_v52  ;;  %v824_v17 = vpop.xlane.xlu1 %823 }
 0x2ff   :  { %1863 = vmatprep.mubr.bf16.mxu1 %v1083_v10  ;;  %v858_v15 = vsub.f32 %v3256_v18, %v824_v17  ;;  %v860_v10 = vsub.f32 %v3257_v35, %v828_v19 }
 0x301   :  { %v923_v44 = vmul.f32 1.442695, %v860_v10 }
 0x302   :  { %1188 = vxpose.xlu1.c.b16.cont [7/8] %v1067_v1, 128  ;;  %v1084_v53 = vpop.trf.xlu0  ;;  %v907_v1 = vmul.f32 1.442695, %v852_v30 }
 0x303   :  { %1864 = vmatmul.mubr.bf16.gmra.mrb[28].mxu1 %v1084_v53  ;;  %v919_v53 = vmul.f32 1.442695, %v858_v15 }
 0x304   :  { %1906 = vmatpush3.bf16.xpose.msra.mxu1 %v3245_v47  ;;  %2088 = vpow2.f32 %v907_v1 }
 0x305   :  { %1907 = vmatprep.subr.bf16.mxu1 %v3247_v59  ;;  %2090 = vpow2.f32 %v903_v22 }
 0x306   :  { %1189 = vxpose.xlu1.c.b16.end [8/8] %v1068_v0, 128  ;;  %v3041_v0 = vpop.eup %2082  ;;  %2092 = vpow2.f32 %v915_v7 }
 0x307   :  { %v3046_v62 = vpop.eup %2084  ;;  %2094 = vpow2.f32 %v911_v45 }
 0x308   :  { %v3051_v5 = vpop.eup %2086  ;;  %2096 = vpow2.f32 %v891_v25 }
 0x309   :  { %2098 = vpow2.f32 %v919_v53 }
 0x30a   :  { %2100 = vpow2.f32 %v923_v44 }
 0x30c   :  { %1908 = vmatpush3.bf16.xpose.msra.mxu1 %v3247_v59 }
 0x30d   :  { %1909 = vmatprep.subr.bf16.mxu1 %v3250_v41 }
 0x30e   :  { %v3055_v61 = vpop.eup %2088 }
 0x30f   :  { %v3063_v47 = vpop.eup %2090 }
 0x310   :  { %v3068_v63 = vpop.eup %2092 }
 0x311   :  { %v3071_v50 = vpop.eup %2094 }
 0x312   :  { %v3074_v39 = vpop.eup %2096 }
 0x313   :  { %951 = vadd.xlane.f32.xlu1 %v3041_v0  ;;  %v3077_v13 = vpop.eup %2098 }
 0x314   :  { %1910 = vmatpush3.bf16.xpose.msra.mxu1 %v3250_v41  ;;  %v3080_v42 = vpop.eup %2100 }
 0x315   :  { %1911 = vmatprep.subr.bf16.mxu1 %v3253_v32 }
 0x317   :  { %963 = vadd.xlane.f32.xlu1 %v3046_v62 }
 0x31b   :  { %959 = vadd.xlane.f32.xlu1 %v3051_v5 }
 0x31c   :  { %1912 = vmatpush3.bf16.xpose.msra.mxu1 %v3253_v32 }
 0x31d   :  { %1913 = vmatprep.subr.bf16.mxu1 %v3255_v54 }
 0x31f   :  { %971 = vadd.xlane.f32.xlu1 %v3055_v61 }
 0x323   :  { %967 = vadd.xlane.f32.xlu1 %v3063_v47 }
 0x324   :  { %1914 = vmatpush3.bf16.xpose.msra.mxu1 %v3255_v54 }
 0x327   :  { %979 = vadd.xlane.f32.xlu1 %v3068_v63 }
 0x32b   :  { %975 = vadd.xlane.f32.xlu1 %v3071_v50 }
 0x32f   :  { %955 = vadd.xlane.f32.xlu1 %v3074_v39 }
 0x333   :  { %983 = vadd.xlane.f32.xlu1 %v3077_v13 }
 0x334   :  { %v932_v56 = vpop.xlane.xlu1 %931 }
 0x335   :  { %2102 = vrcp.f32 %v932_v56 }
 0x336   :  { %v930_v59 = vpop.xlane.xlu0 %929 }
 0x337   :  { %987 = vadd.xlane.f32.xlu1 %v3080_v42  ;;  %2104 = vrcp.f32 %v930_v59 }
 0x33a   :  { %v928_v26 = vpop.xlane.xlu1 %927  ;;  %v926_v58 = vpop.xlane.xlu0 %925 }
 0x33b   :  { %2106 = vrcp.f32 %v928_v26  ;;  %v3258_v26 = vld [vmem:[#allocation18_spill] sm:$0xff] }
 0x33c   :  { %2108 = vrcp.f32 %v926_v58  ;;  %v3259_v58 = vld [vmem:[#allocation20_spill] sm:$0xff] }
 0x33e   :  { %v940_v29 = vpop.xlane.xlu1 %939  ;;  %v938_v3 = vpop.xlane.xlu0 %937 }
 0x33f   :  { %2110 = vrcp.f32 %v940_v29  ;;  %v2103_v52 = vpop.eup %2102 }
 0x340   :  { %2112 = vrcp.f32 %v938_v3  ;;  %v1024_v2 = vmul.f32 %v2103_v52, %v2886_v8 }
 0x341   :  { %v2105_v30 = vpop.eup %2104 }
 0x342   :  { %v936_v31 = vpop.xlane.xlu1 %935  ;;  %v934_v41 = vpop.xlane.xlu0 %933  ;;  %v1023_v40 = vmul.f32 %v2105_v30, %v2891_v28 }
 0x343   :  { %2114 = vrcp.f32 %v936_v31 }
 0x344   :  { %2116 = vrcp.f32 %v934_v41  ;;  %v1328_v43 = vpack.c.bf16 %v1024_v2, %v1023_v40  ;;  %v3264_v40 = vld [vmem:[#allocation29_spill] sm:$0xff]  ;;  %v3265_v2 = vld [vmem:[#allocation30_spill] sm:$0xff] }
 0x345   :  { %v2107_v1 = vpop.eup %2106 }
 0x346   :  { %v2109_v55 = vpop.eup %2108  ;;  %v948_v22 = vpop.xlane.xlu1 %947  ;;  %v1022_v16 = vmul.f32 %v2107_v1, %v2922_v60  ;;  %v3262_v1 = vld [vmem:[#allocation27_spill] sm:$0xff] }
 0x347   :  { %v946_v46 = vpop.xlane.xlu0 %945  ;;  %v1021_v32 = vmul.f32 %v2109_v55, %v2916_v21  ;;  %2118 = vrcp.f32 %v948_v22  ;;  %v3263_v55 = vld [vmem:[#allocation28_spill] sm:$0xff] }
 0x348   :  { %2120 = vrcp.f32 %v946_v46 }
 0x349   :  { %v1327_v19 = vpack.c.bf16 %v1022_v16, %v1021_v32  ;;  %v2111_v7 = vpop.eup %2110 }
 0x34a   :  { %v944_v20 = vpop.xlane.xlu1 %943  ;;  %v2113_v45 = vpop.eup %2112  ;;  %v1028_v21 = vmul.f32 %v2111_v7, %v2926_v14 }
 0x34b   :  { %v942_v17 = vpop.xlane.xlu0 %941  ;;  %1915 = vmatprep.mubr.bf16.mxu1 %v1327_v19  ;;  %2122 = vrcp.f32 %v944_v20  ;;  %v1027_v60 = vmul.f32 %v2113_v45, %v2932_v6 }
 0x34c   :  { %2124 = vrcp.f32 %v942_v17  ;;  %1916 = vmatmul.mubr.bf16.vlgmr.msra.gmra.mrb[32].mxu1 %v1328_v43 }
 0x34d   :  { %v2115_v28 = vpop.eup %2114  ;;  %v1330_v10 = vpack.c.bf16 %v1028_v21, %v1027_v60 }
 0x34e   :  { %v2117_v8 = vpop.eup %2116  ;;  %v1026_v54 = vmul.f32 %v2115_v28, %v2938_v38 }
 0x34f   :  { %v1025_v25 = vmul.f32 %v2117_v8, %v2942_v33 }
 0x350   :  { %v1190_v18 = vpop.trf.xlu1 }
 0x351   :  { %v1329_v15 = vpack.c.bf16 %v1026_v54, %v1025_v25  ;;  %1883 = vmatprep.mubr.bf16.mxu0 %v1190_v18  ;;  %v2119_v35 = vpop.eup %2118 }
 0x352   :  { %v2121_v53 = vpop.eup %2120  ;;  %v1032_v14 = vmul.f32 %v2119_v35, %v2949_v24  ;;  %v950_v22 = vpop.xlane.xlu0 %949 }
 0x353   :  { %1919 = vmatprep.mubr.bf16.mxu1 %v1329_v15  ;;  %v1031_v6 = vmul.f32 %v2121_v53, %v2951_v4  ;;  %2126 = vrcp.f32 %v950_v22 }
 0x354   :  { %1920 = vmatmul.mubr.bf16.gmra.mrb[36].mxu1 %v1330_v10  ;;  %v1191_v44 = vpop.trf.xlu1 }
 0x355   :  { %v2123_v56 = vpop.eup %2122  ;;  %1884 = vmatmul.mubr.bf16.vlgmr.msra.gmra.mrb[48].mxu0 %v1191_v44  ;;  %v1332_v52 = vpack.c.bf16 %v1032_v14, %v1031_v6 }
 0x356   :  { %v2125_v59 = vpop.eup %2124  ;;  %v1030_v38 = vmul.f32 %v2123_v56, %v2957_v36  ;;  %1932 = vmatpush3.bf16.xpose.msra.mxu0 %v3258_v26  ;;  %v3260_v36 = vld [vmem:[#allocation22_spill] sm:$0xff]  ;;  %v962_v16 = vpop.xlane.xlu0 %961 }
 0x357   :  { %v1029_v33 = vmul.f32 %v2125_v59, %v2959_v49  ;;  %1933 = vmatprep.subr.bf16.mxu0 %v3259_v58  ;;  %v3261_v49 = vld [vmem:[#allocation24_spill] sm:$0xff] }
 0x358   :  { %v1192_v29 = vpop.trf.xlu1 }
 0x359   :  { %v1331_v3 = vpack.c.bf16 %v1030_v38, %v1029_v33  ;;  %1887 = vmatprep.mubr.bf16.mxu0 %v1192_v29 }
 0x35a   :  { %v958_v46 = vpop.xlane.xlu0 %957 }
 0x35b   :  { %1923 = vmatprep.mubr.bf16.mxu1 %v1331_v3 }
 0x35c   :  { %1924 = vmatmul.mubr.bf16.gmra.mrb[40].mxu1 %v1332_v52  ;;  %v1193_v31 = vpop.trf.xlu1 }
 0x35d   :  { %1888 = vmatmul.mubr.bf16.gmra.mrb[52].mxu0 %v1193_v31  ;;  %v2127_v17 = vpop.eup %2126 }
 0x35e   :  { %1934 = vmatpush3.bf16.xpose.msra.mxu0 %v3259_v58  ;;  %v970_v32 = vpop.xlane.xlu0 %969  ;;  %v1033_v54 = vmul.f32 %v2127_v17, %v2965_v9 }
 0x35f   :  { %1935 = vmatprep.subr.bf16.mxu0 %v3260_v36 }
 0x360   :  { %v1194_v4 = vpop.trf.xlu1 }
 0x361   :  { %1891 = vmatprep.mubr.bf16.mxu0 %v1194_v4 }
 0x362   :  { %v966_v7 = vpop.xlane.xlu0 %965 }
 0x364   :  { %v1195_v24 = vpop.trf.xlu1 }
 0x365   :  { %1892 = vmatmul.mubr.bf16.gmra.mrb[56].mxu0 %v1195_v24 }
 0x366   :  { %1936 = vmatpush3.bf16.xpose.msra.mxu0 %v3260_v36  ;;  %v978_v43 = vpop.xlane.xlu0 %977 }
 0x367   :  { %1937 = vmatprep.subr.bf16.mxu0 %v3261_v49 }
 0x368   :  { %v1196_v30 = vpop.trf.xlu1 }
 0x369   :  { %1895 = vmatprep.mubr.bf16.mxu0 %v1196_v30 }
 0x36a   :  { %v974_v21 = vpop.xlane.xlu0 %973 }
 0x36c   :  { %v1197_v41 = vpop.trf.xlu1 }
 0x36d   :  { %1896 = vmatmul.mubr.bf16.gmra.mrb[60].mxu0 %v1197_v41 }
 0x36e   :  { %1938 = vmatpush3.bf16.xpose.msra.mxu0 %v3261_v49  ;;  %v954_v44 = vpop.xlane.xlu0 %953 }
 0x36f   :  { %1939 = vmatprep.subr.bf16.mxu0 %v3262_v1 }
 0x372   :  { %v982_v29 = vpop.xlane.xlu0 %981 }
 0x376   :  { %1940 = vmatpush3.bf16.xpose.msra.mxu0 %v3262_v1  ;;  %v986_v4 = vpop.xlane.xlu0 %985 }
 0x377   :  { %1941 = vmatprep.subr.bf16.mxu0 %v3263_v55 }
 0x37e   :  { %1942 = vmatpush3.bf16.xpose.msra.mxu0 %v3263_v55 }
 0x37f   :  { %1943 = vmatprep.subr.bf16.mxu0 %v3264_v40 }
 0x386   :  { %1944 = vmatpush3.bf16.xpose.msra.mxu0 %v3264_v40 }
 0x387   :  { %1945 = vmatprep.subr.bf16.mxu0 %v3265_v2 }
 0x38e   :  { %1946 = vmatpush3.bf16.xpose.msra.mxu0 %v3265_v2 }
 0x3a0   :  { %v952_v19 = vpop.xlane.xlu1 %951 }
 0x3a1   :  { %2128 = vrcp.f32 %v952_v19 }
 0x3a4   :  { %v964_v20 = vpop.xlane.xlu1 %963 }
 0x3a5   :  { %2130 = vrcp.f32 %v964_v20 }
 0x3a6   :  { %2132 = vrcp.f32 %v958_v46 }
 0x3a7   :  { %2134 = vrcp.f32 %v962_v16 }
 0x3a8   :  { %v960_v45 = vpop.xlane.xlu1 %959 }
 0x3a9   :  { %2136 = vrcp.f32 %v960_v45 }
 0x3ab   :  { %v2129_v28 = vpop.eup %2128 }
 0x3ac   :  { %v972_v8 = vpop.xlane.xlu1 %971  ;;  %v1034_v60 = vmul.f32 %v2129_v28, %v3041_v0 }
 0x3ad   :  { %2138 = vrcp.f32 %v972_v8 }
 0x3ae   :  { %v1333_v25 = vpack.c.bf16 %v1034_v60, %v1033_v54  ;;  %2140 = vrcp.f32 %v966_v7 }
 0x3af   :  { %v2131_v18 = vpop.eup %2130  ;;  %2142 = vrcp.f32 %v970_v32 }
 0x3b0   :  { %1927 = vmatprep.mubr.bf16.mxu1 %v1333_v25  ;;  %v968_v15 = vpop.xlane.xlu1 %967  ;;  %v2133_v35 = vpop.eup %2132  ;;  %v1040_v56 = vmul.f32 %v2131_v18, %v3046_v62 }
 0x3b1   :  { %2144 = vrcp.f32 %v968_v15  ;;  %v2135_v10 = vpop.eup %2134  ;;  %v1037_v9 = vmul.f32 %v2133_v35, %v2973_v51 }
 0x3b2   :  { %v1039_v38 = vmul.f32 %v2135_v10, %v2969_v48 }
 0x3b3   :  { %v2137_v53 = vpop.eup %2136 }
 0x3b4   :  { %v980_v59 = vpop.xlane.xlu1 %979  ;;  %v1038_v0 = vmul.f32 %v2137_v53, %v3051_v5  ;;  %v1336_v14 = vpack.c.bf16 %v1040_v56, %v1039_v38 }
 0x3b5   :  { %2146 = vrcp.f32 %v980_v59 }
 0x3b6   :  { %v1335_v6 = vpack.c.bf16 %v1038_v0, %v1037_v9  ;;  %2148 = vrcp.f32 %v974_v21 }
 0x3b7   :  { %v2139_v26 = vpop.eup %2138  ;;  %2150 = vrcp.f32 %v978_v43 }
 0x3b8   :  { %1947 = vmatprep.mubr.bf16.mxu0 %v1335_v6  ;;  %v976_v33 = vpop.xlane.xlu1 %975  ;;  %v2141_v58 = vpop.eup %2140  ;;  %v1044_v51 = vmul.f32 %v2139_v26, %v3055_v61 }
 0x3b9   :  { %2152 = vrcp.f32 %v976_v33  ;;  %1948 = vmatmul.mubr.bf16.vlgmr.msra.gmra.mrb[64].mxu0 %v1336_v14  ;;  %v2143_v62 = vpop.eup %2142  ;;  %v1041_v48 = vmul.f32 %v2141_v58, %v2981_v57 }
 0x3ba   :  { %2154 = vrcp.f32 %v954_v44  ;;  %v1043_v31 = vmul.f32 %v2143_v62, %v2977_v34 }
 0x3bb   :  { %v2145_v3 = vpop.eup %2144 }
 0x3bc   :  { %v956_v5 = vpop.xlane.xlu1 %955  ;;  %v1042_v52 = vmul.f32 %v2145_v3, %v3063_v47  ;;  %v1338_v24 = vpack.c.bf16 %v1044_v51, %v1043_v31 }
 0x3bd   :  { %2156 = vrcp.f32 %v956_v5 }
 0x3be   :  { %v1337_v36 = vpack.c.bf16 %v1042_v52, %v1041_v48  ;;  %2158 = vrcp.f32 %v982_v29  ;;  %v1853_v49 = vpop.f32.mrb[16].mxu1 }
 0x3bf   :  { %v2147_v30 = vpop.eup %2146  ;;  %1297 = vst [vmem:[#allocation8 + $0x10] sm:$0xff] %v1853_v49  ;;  %v1119_v1 = vpop.f32.mrb[17].mxu1 }
 0x3c0   :  { %1951 = vmatprep.mubr.bf16.mxu0 %v1337_v36  ;;  %v984_v41 = vpop.xlane.xlu1 %983  ;;  %v2149_v55 = vpop.eup %2148  ;;  %1295 = vst [vmem:[#allocation8] sm:$0xff] %v1119_v1  ;;  %v1048_v34 = vmul.f32 %v2147_v30, %v3068_v63 }
 0x3c1   :  { %2160 = vrcp.f32 %v984_v41  ;;  %1952 = vmatmul.mubr.bf16.gmra.mrb[68].mxu0 %v1338_v24  ;;  %v1854_v57 = vpop.f32.mrb[18].mxu1  ;;  %v2151_v61 = vpop.eup %2150  ;;  %v1045_v22 = vmul.f32 %v2149_v55, %v2988_v27 }
 0x3c2   :  { %1298 = vst [vmem:[#allocation8 + $0x18] sm:$0xff] %v1854_v57  ;;  %v1122_v47 = vpop.f32.mrb[19].mxu1  ;;  %2162 = vrcp.f32 %v986_v4  ;;  %v1047_v32 = vmul.f32 %v2151_v61, %v2985_v37 }
 0x3c3   :  { %v2153_v40 = vpop.eup %2152  ;;  %1296 = vst [vmem:[#allocation8 + $0x8] sm:$0xff] %v1122_v47 }
 0x3c4   :  { %v988_v2 = vpop.xlane.xlu1 %987  ;;  %v1046_v16 = vmul.f32 %v2153_v40, %v3071_v50  ;;  %v2155_v46 = vpop.eup %2154  ;;  %v1340_v20 = vpack.c.bf16 %v1048_v34, %v1047_v32 }
 0x3c5   :  { %2164 = vrcp.f32 %v988_v2  ;;  %v1035_v45 = vmul.f32 %v2155_v46, %v2991_v23 }
 0x3c6   :  { %v1339_v19 = vpack.c.bf16 %v1046_v16, %v1045_v22  ;;  %v1857_v43 = vpop.f32.mrb[20].mxu1 }
 0x3c7   :  { %v2157_v7 = vpop.eup %2156  ;;  %1301 = vst [vmem:[#allocation8 + $0x30] sm:$0xff] %v1857_v43  ;;  %v1135_v63 = vpop.f32.mrb[21].mxu1 }
 0x3c8   :  { %1955 = vmatprep.mubr.bf16.mxu0 %v1339_v19  ;;  %v1036_v17 = vmul.f32 %v2157_v7, %v3074_v39  ;;  %v2159_v28 = vpop.eup %2158  ;;  %1299 = vst [vmem:[#allocation8 + $0x20] sm:$0xff] %v1135_v63  ;;  %v1858_v27 = vpop.f32.mrb[22].mxu1 }
 0x3c9   :  { %1956 = vmatmul.mubr.bf16.gmra.mrb[72].mxu0 %v1340_v20  ;;  %1302 = vst [vmem:[#allocation8 + $0x38] sm:$0xff] %v1858_v27  ;;  %v1138_v8 = vpop.f32.mrb[23].mxu1  ;;  %v1049_v37 = vmul.f32 %v2159_v28, %v2994_v11 }
 0x3ca   :  { %v1334_v50 = vpack.c.bf16 %v1036_v17, %v1035_v45  ;;  %1300 = vst [vmem:[#allocation8 + $0x28] sm:$0xff] %v1138_v8 }
 0x3cb   :  { %v2161_v54 = vpop.eup %2160 }
 0x3cc   :  { %1928 = vmatmul.mubr.bf16.gmra.mrb[44].mxu1 %v1334_v50  ;;  %v1050_v60 = vmul.f32 %v2161_v54, %v3077_v13  ;;  %v2163_v21 = vpop.eup %2162 }
 0x3cd   :  { %v1051_v18 = vmul.f32 %v2163_v21, %v2997_v12 }
 0x3ce   :  { %v1341_v23 = vpack.c.bf16 %v1050_v60, %v1049_v37  ;;  %v1861_v39 = vpop.f32.mrb[24].mxu1 }
 0x3cf   :  { %v2165_v25 = vpop.eup %2164  ;;  %1305 = vst [vmem:[#allocation8 + $0x50] sm:$0xff] %v1861_v39  ;;  %v1151_v35 = vpop.f32.mrb[25].mxu1 }
 0x3d0   :  { %1959 = vmatprep.mubr.bf16.mxu0 %v1341_v23  ;;  %v1052_v15 = vmul.f32 %v2165_v25, %v3080_v42  ;;  %1303 = vst [vmem:[#allocation8 + $0x40] sm:$0xff] %v1151_v35  ;;  %v1862_v10 = vpop.f32.mrb[26].mxu1 }
 0x3d1   :  { %1306 = vst [vmem:[#allocation8 + $0x58] sm:$0xff] %v1862_v10  ;;  %v1154_v44 = vpop.f32.mrb[27].mxu1 }
 0x3d2   :  { %v1342_v53 = vpack.c.bf16 %v1052_v15, %v1051_v18  ;;  %1304 = vst [vmem:[#allocation8 + $0x48] sm:$0xff] %v1154_v44 }
 0x3d4   :  { %1960 = vmatmul.mubr.bf16.gmra.mrb[76].mxu0 %v1342_v53 }
 0x3d6   :  { %v1865_v11 = vpop.f32.mrb[28].mxu1 }
 0x3d7   :  { %1309 = vst [vmem:[#allocation8 + $0x70] sm:$0xff] %v1865_v11  ;;  %v1167_v13 = vpop.f32.mrb[29].mxu1 }
 0x3d8   :  { %1307 = vst [vmem:[#allocation8 + $0x60] sm:$0xff] %v1167_v13  ;;  %v1866_v56 = vpop.f32.mrb[30].mxu1 }
 0x3d9   :  { %1310 = vst [vmem:[#allocation8 + $0x78] sm:$0xff] %v1866_v56  ;;  %v1170_v59 = vpop.f32.mrb[31].mxu1 }
 0x3da   :  { %1308 = vst [vmem:[#allocation8 + $0x68] sm:$0xff] %v1170_v59 }
 0x41f   :  { %v1917_v12 = vpop.f32.mrb[32].mxu1 }
 0x420   :  { %1539 = vst [vmem:[#allocation9 + $0x10] sm:$0xff] %v1917_v12  ;;  %v1377_v42 = vpop.f32.mrb[33].mxu1 }
 0x421   :  { %1537 = vst [vmem:[#allocation9] sm:$0xff] %v1377_v42  ;;  %v1918_v9 = vpop.f32.mrb[34].mxu1 }
 0x422   :  { %1540 = vst [vmem:[#allocation9 + $0x18] sm:$0xff] %v1918_v9  ;;  %v1380_v0 = vpop.f32.mrb[35].mxu1 }
 0x423   :  { %1538 = vst [vmem:[#allocation9 + $0x8] sm:$0xff] %v1380_v0 }
 0x427   :  { %v1921_v38 = vpop.f32.mrb[36].mxu1 }
 0x428   :  { %1543 = vst [vmem:[#allocation9 + $0x30] sm:$0xff] %v1921_v38  ;;  %v1393_v6 = vpop.f32.mrb[37].mxu1  ;;  %v1885_v14 = vpop.f32.mrb[48].mxu0 }
 0x429   :  { %1541 = vst [vmem:[#allocation9 + $0x20] sm:$0xff] %v1393_v6  ;;  %v1922_v26 = vpop.f32.mrb[38].mxu1  ;;  %1313 = vst [vmem:[#allocation8 + $0x90] sm:$0xff] %v1885_v14  ;;  %v1232_v33 = vpop.f32.mrb[49].mxu0 }
 0x42a   :  { %1544 = vst [vmem:[#allocation9 + $0x38] sm:$0xff] %v1922_v26  ;;  %v1396_v58 = vpop.f32.mrb[39].mxu1  ;;  %1311 = vst [vmem:[#allocation8 + $0x80] sm:$0xff] %v1232_v33  ;;  %v1886_v29 = vpop.f32.mrb[50].mxu0 }
 0x42b   :  { %1542 = vst [vmem:[#allocation9 + $0x28] sm:$0xff] %v1396_v58  ;;  %1314 = vst [vmem:[#allocation8 + $0x98] sm:$0xff] %v1886_v29  ;;  %v1235_v62 = vpop.f32.mrb[51].mxu0 }
 0x42c   :  { %1312 = vst [vmem:[#allocation8 + $0x88] sm:$0xff] %v1235_v62 }
 0x42f   :  { %v1925_v3 = vpop.f32.mrb[40].mxu1 }
 0x430   :  { %1547 = vst [vmem:[#allocation9 + $0x50] sm:$0xff] %v1925_v3  ;;  %v1409_v51 = vpop.f32.mrb[41].mxu1  ;;  %v1889_v5 = vpop.f32.mrb[52].mxu0 }
 0x431   :  { %1545 = vst [vmem:[#allocation9 + $0x40] sm:$0xff] %v1409_v51  ;;  %v1926_v48 = vpop.f32.mrb[42].mxu1  ;;  %1317 = vst [vmem:[#allocation8 + $0xb0] sm:$0xff] %v1889_v5  ;;  %v1248_v52 = vpop.f32.mrb[53].mxu0 }
 0x432   :  { %1548 = vst [vmem:[#allocation9 + $0x58] sm:$0xff] %v1926_v48  ;;  %v1412_v31 = vpop.f32.mrb[43].mxu1  ;;  %1315 = vst [vmem:[#allocation8 + $0xa0] sm:$0xff] %v1248_v52  ;;  %v1890_v36 = vpop.f32.mrb[54].mxu0 }
 0x433   :  { %1546 = vst [vmem:[#allocation9 + $0x48] sm:$0xff] %v1412_v31  ;;  %1318 = vst [vmem:[#allocation8 + $0xb8] sm:$0xff] %v1890_v36  ;;  %v1251_v4 = vpop.f32.mrb[55].mxu0 }
 0x434   :  { %1316 = vst [vmem:[#allocation8 + $0xa8] sm:$0xff] %v1251_v4 }
 0x438   :  { %v1893_v24 = vpop.f32.mrb[56].mxu0 }
 0x439   :  { %1321 = vst [vmem:[#allocation8 + $0xd0] sm:$0xff] %v1893_v24  ;;  %v1264_v49 = vpop.f32.mrb[57].mxu0 }
 0x43a   :  { %1319 = vst [vmem:[#allocation8 + $0xc0] sm:$0xff] %v1264_v49  ;;  %v1894_v30 = vpop.f32.mrb[58].mxu0 }
 0x43b   :  { %1322 = vst [vmem:[#allocation8 + $0xd8] sm:$0xff] %v1894_v30  ;;  %v1267_v41 = vpop.f32.mrb[59].mxu0 }
 0x43c   :  { %1320 = vst [vmem:[#allocation8 + $0xc8] sm:$0xff] %v1267_v41 }
 0x440   :  { %v1897_v1 = vpop.f32.mrb[60].mxu0 }
 0x441   :  { %1325 = vst [vmem:[#allocation8 + $0xf0] sm:$0xff] %v1897_v1  ;;  %v1280_v55 = vpop.f32.mrb[61].mxu0 }
 0x442   :  { %1323 = vst [vmem:[#allocation8 + $0xe0] sm:$0xff] %v1280_v55  ;;  %v1898_v57 = vpop.f32.mrb[62].mxu0 }
 0x443   :  { %1326 = vst [vmem:[#allocation8 + $0xf8] sm:$0xff] %v1898_v57  ;;  %v1283_v61 = vpop.f32.mrb[63].mxu0 }
 0x444   :  { %1324 = vst [vmem:[#allocation8 + $0xe8] sm:$0xff] %v1283_v61 }
 0x445   :  { %2243 = shalt.err (!%p2240_p0)
}
 0x446   :  { %s2244_s5 = scalar_lea.hbm %s3163_s3, 4096 }
 0x447   :  { %p2245_p1 = scmp.ne.s32.totalorder %s3163_s3, %s2244_s5  ;;  %p2248_p2 = scmp.lt.u32.totalorder %s2244_s5, %s3163_s3 }
 0x449   :  { %p2250_p3 = pnand %p2248_p2, %p2245_p1 }
 0x44b   :  { %2253 = shalt.err (!%p2250_p3)
}
 0x44c   :  { %1580 = dma.vmem_to_hbm [thread:$0]  %s1575_s25, 4096, %s3163_s3, [#allocation4], %s2286_s27, %s2286_s27, %s2287_s28  }
 0x44d   :  { %s2290_s3 = smov [#allocation9]  }
 0x44e   :  { %s1586_s12 = sshll.u32 %s2290_s3, 4  ;;  %s1587_s12 = int_to_ptr.vmem [resolvable:$true] %s1586_s12 }
 0x44f   :  { %s2254_s1 = scalar_lea.vmem %s1587_s12, 4096  ;;  %p2259_p5 = scmp.lt.s32.totalorder %s1587_s12, %s1587_s12 }
 0x450   :  { %p2255_p4 = scmp.ne.s32.totalorder %s1587_s12, %s2254_s1  ;;  %p2260_p6 = scmp.lt.s32.totalorder %s2254_s1, %s2254_s1 }
 0x452   :  { %p2261_p7 = por %p2260_p6, %p2259_p5 }
 0x454   :  { %p2262_p8 = pnand %p2261_p7, %p2255_p4 }
 0x48c   :  { %v1949_v47 = vpop.f32.mrb[64].mxu0 }
 0x48d   :  { %1555 = vst [vmem:[#allocation9 + $0x90] sm:$0xff] %v1949_v47  ;;  %v1474_v40 = vpop.f32.mrb[65].mxu0 }
 0x48e   :  { %1553 = vst [vmem:[#allocation9 + $0x80] sm:$0xff] %v1474_v40  ;;  %v1950_v34 = vpop.f32.mrb[66].mxu0 }
 0x48f   :  { %1556 = vst [vmem:[#allocation9 + $0x98] sm:$0xff] %v1950_v34  ;;  %v1477_v2 = vpop.f32.mrb[67].mxu0 }
 0x490   :  { %1554 = vst [vmem:[#allocation9 + $0x88] sm:$0xff] %v1477_v2 }
 0x494   :  { %v1953_v22 = vpop.f32.mrb[68].mxu0 }
 0x495   :  { %1559 = vst [vmem:[#allocation9 + $0xb0] sm:$0xff] %v1953_v22  ;;  %v1490_v16 = vpop.f32.mrb[69].mxu0 }
 0x496   :  { %1557 = vst [vmem:[#allocation9 + $0xa0] sm:$0xff] %v1490_v16  ;;  %v1954_v46 = vpop.f32.mrb[70].mxu0 }
 0x497   :  { %1560 = vst [vmem:[#allocation9 + $0xb8] sm:$0xff] %v1954_v46  ;;  %v1493_v32 = vpop.f32.mrb[71].mxu0 }
 0x498   :  { %1558 = vst [vmem:[#allocation9 + $0xa8] sm:$0xff] %v1493_v32 }
 0x49c   :  { %v1957_v19 = vpop.f32.mrb[72].mxu0 }
 0x49d   :  { %1563 = vst [vmem:[#allocation9 + $0xd0] sm:$0xff] %v1957_v19  ;;  %v1506_v7 = vpop.f32.mrb[73].mxu0 }
 0x49e   :  { %1561 = vst [vmem:[#allocation9 + $0xc0] sm:$0xff] %v1506_v7  ;;  %v1958_v20 = vpop.f32.mrb[74].mxu0 }
 0x49f   :  { %1564 = vst [vmem:[#allocation9 + $0xd8] sm:$0xff] %v1958_v20  ;;  %v1929_v43 = vpop.f32.mrb[44].mxu1  ;;  %v1509_v45 = vpop.f32.mrb[75].mxu0 }
 0x4a0   :  { %1551 = vst [vmem:[#allocation9 + $0x70] sm:$0xff] %v1929_v43  ;;  %1562 = vst [vmem:[#allocation9 + $0xc8] sm:$0xff] %v1509_v45  ;;  %v1425_v17 = vpop.f32.mrb[45].mxu1 }
 0x4a1   :  { %1549 = vst [vmem:[#allocation9 + $0x60] sm:$0xff] %v1425_v17  ;;  %v1930_v63 = vpop.f32.mrb[46].mxu1 }
 0x4a2   :  { %1552 = vst [vmem:[#allocation9 + $0x78] sm:$0xff] %v1930_v63  ;;  %v1428_v28 = vpop.f32.mrb[47].mxu1 }
 0x4a3   :  { %1550 = vst [vmem:[#allocation9 + $0x68] sm:$0xff] %v1428_v28 }
 0x4a7   :  { %v1961_v27 = vpop.f32.mrb[76].mxu0 }
 0x4a8   :  { %1567 = vst [vmem:[#allocation9 + $0xf0] sm:$0xff] %v1961_v27  ;;  %v1522_v50 = vpop.f32.mrb[77].mxu0 }
 0x4a9   :  { %1565 = vst [vmem:[#allocation9 + $0xe0] sm:$0xff] %v1522_v50  ;;  %v1962_v8 = vpop.f32.mrb[78].mxu0 }
 0x4aa   :  { %1568 = vst [vmem:[#allocation9 + $0xf8] sm:$0xff] %v1962_v8  ;;  %v1525_v54 = vpop.f32.mrb[79].mxu0 }
 0x4ab   :  { %1566 = vst [vmem:[#allocation9 + $0xe8] sm:$0xff] %v1525_v54 }
 0x4ac   :  { %2265 = shalt.err (!%p2262_p8)
}
 0x4ad   :  { %s2266_s15 = scalar_lea.hbm %s3164_s4, 4096 }
 0x4ae   :  { %p2267_p9 = scmp.ne.s32.totalorder %s3164_s4, %s2266_s15  ;;  %p2270_p10 = scmp.lt.u32.totalorder %s2266_s15, %s3164_s4 }
 0x4b0   :  { %p2272_p11 = pnand %p2270_p10, %p2267_p9 }
 0x4b2   :  { %2275 = shalt.err (!%p2272_p11)
}
 0x4b3   :  { %1592 = dma.vmem_to_hbm [thread:$0]  %s1587_s12, 4096, %s3164_s4, [#allocation10], %s2286_s27, %s2286_s27, %s2287_s28  }
 0x4b4   :  { %2280 = dma.done.wait [#allocation4], 4096  }
 0x4b5   :  { %2281 = vsyncadd [#allocation4], 4294963200 }
 0x4b6   :  { %2282 = dma.done.wait [#allocation10], 4096  }
 0x4b7   :  { %2283 = vsyncadd [#allocation10], 4294963200 }
 0x4b8   :  { %1599 = vsyncpa [#allocation3], 1 }
 0x4b9   :  { %1600 = vsyncpa [#allocation6], 1 }
 0x4ba   :  { %1601 = vsyncpa [#allocation4], 1 }
 0x4bb   :  { %1602 = vsyncpa [#allocation10], 1 }

</bundles_post_ra>
